<compile_context>
chip_gen: v6e
topology: v6e:2x2x1
jax: 0.10.0
libtpu: 0.0.40
codegen_flags: <defaults>
</compile_context>

<pallas_src>
import functools
import math

import jax
import jax.numpy as jnp
from jax.experimental import pallas as pl
from jax.experimental.pallas import tpu as pltpu


# ------------------------------ small helpers ------------------------------ #

def _round_up(x, m):
    return ((x + m - 1) // m) * m


def _choose_h_tile(h_out, w_out, max_m=2048):
    """Output-row tile th: divides h_out, th*w_out is a multiple of 128 (lane-
    dense stores) and th*w_out <= max_m (bounds the in-kernel (M, 128) f32 conv
    block to ~1 MiB so double-buffered operands fit v7x's 64 MiB VMEM)."""
    base = 128 // math.gcd(w_out, 128)
    best = None
    for th in range(base, h_out + 1, base):
        if h_out % th == 0 and th * w_out <= max_m:
            best = th
    if best is None:
        # TODO(synk): ragged / unaligned h_out falls back to one tile per image
        # (correct, but neither lane-aligned nor VMEM-bounded for huge images).
        best = h_out
    return best


# ------------------------------ Pallas kernels ------------------------------ #

def _conv_tile(x_ref, w_ref, ht, *, kh, th, w_out):
    """Conv output rows [ht*th, ht*th+th) as a (th*w_out, c_pad) f32 block.

    x_ref: (hp, w_out, kw*c_in)  -- kw shifts pre-merged into the lane dim
    w_ref: (kh, kw*c_in, c_pad)
    One K = kw*c_in MXU dot per kh row; kh-1 accumulate adds total.
    """
    kwc = w_ref.shape[1]
    row0 = ht * th
    acc = None
    for i in range(kh):                          # static, tiny (kh)
        lhs = x_ref[pl.ds(row0 + i, th)]         # (th, w_out, kwc): outer-dim slice
        lhs = lhs.reshape(th * w_out, kwc)       # leading-dim merge (cheap)
        part = jnp.dot(lhs, w_ref[i], preferred_element_type=jnp.float32)
        acc = part if acc is None else acc + part
    return acc


def _conv_stats_kernel(x_ref, w_ref, stats_ref, *, kh, th, w_out):
    """Pass 1: conv for one (image, h-tile); emit only BN partial sums."""
    y = _conv_tile(x_ref, w_ref, pl.program_id(1), kh=kh, th=th, w_out=w_out)
    stats_ref[0:1, :] = jnp.sum(y, axis=0, keepdims=True)        # sum
    stats_ref[1:2, :] = jnp.sum(y * y, axis=0, keepdims=True)    # sum of squares


def _conv_bn_relu_kernel(x_ref, w_ref, scale_ref, shift_ref, o_ref, *,
                         kh, th, w_out, c_out):
    """Pass 2: recompute conv, fuse normalize + affine + ReLU, lane-dense store."""
    y = _conv_tile(x_ref, w_ref, pl.program_id(1), kh=kh, th=th, w_out=w_out)
    yt = jnp.transpose(y[:, :c_out], (1, 0))     # slice to real channels FIRST
    o_ref[...] = jnp.maximum(yt * scale_ref[...] + shift_ref[...], 0.0)


# -------------------------------- Host wrapper ------------------------------ #

@functools.partial(jax.jit, static_argnames=("kernel_size", "padding"))
def conv_block(x_nchw, conv_w, conv_b, bn_gamma, bn_beta,
               kernel_size=3, padding=1):
    """conv_block.forward: relu(batchnorm(conv(x))), BatchNorm in training mode."""
    n, c_in, h, w = x_nchw.shape
    c_out, _, kh, kw = conv_w.shape
    assert kh == kernel_size and kw == kernel_size
    # conv_b is dropped on purpose: training-mode BatchNorm subtracts the
    # per-channel batch mean right after the conv, cancelling the bias exactly.
    del conv_b

    c_pad = _round_up(c_out, 128)
    hp, wp = h + 2 * padding, w + 2 * padding
    h_out, w_out = hp - kh + 1, wp - kw + 1
    m_img = h_out * w_out
    kwc = kw * c_in

    th = _choose_h_tile(h_out, w_out)
    n_ht = h_out // th

    # Glue: NCHW -> NHWC, spatial zero-pad, and pre-merge the kw shifts into the
    # lane dim (3x, NOT 9x im2col): x_shift[n,r,c,j*c_in+k] = x_pad[n,r,c+j,k].
    x_nhwc = jnp.transpose(x_nchw, (0, 2, 3, 1))
    x_pad = jnp.pad(x_nhwc, ((0, 0), (padding, padding),
                             (padding, padding), (0, 0)))
    x_shift = jnp.concatenate(
        [x_pad[:, :, j:j + w_out, :] for j in range(kw)], axis=-1)  # (n,hp,w_out,kwc)

    # Weights: (c_out, c_in, kh, kw) -> (kh, kw*c_in, c_pad), zero-padded lanes.
    w_mat = jnp.transpose(conv_w, (2, 3, 1, 0)).reshape(kh, kwc, c_out)
    w_mat = jnp.pad(w_mat, ((0, 0), (0, 0), (0, c_pad - c_out)))

    cparams = pltpu.CompilerParams(
        dimension_semantics=("parallel", "parallel"),
        vmem_limit_bytes=48 * 1024 * 1024)

    x_spec = pl.BlockSpec((None, hp, w_out, kwc), lambda i, t: (i, 0, 0, 0))
    w_spec = pl.BlockSpec((kh, kwc, c_pad), lambda i, t: (0, 0, 0))

    # ---- Pass 1: conv + partial BN statistics (no big intermediate) ---------
    stats = pl.pallas_call(
        functools.partial(_conv_stats_kernel, kh=kh, th=th, w_out=w_out),
        out_shape=jax.ShapeDtypeStruct((n, n_ht, 2, c_pad), jnp.float32),
        grid_spec=pltpu.PrefetchScalarGridSpec(
            num_scalar_prefetch=0,
            grid=(n, n_ht),
            in_specs=[x_spec, w_spec],
            out_specs=pl.BlockSpec((None, None, 2, c_pad),
                                   lambda i, t: (i, t, 0, 0)),
        ),
        compiler_params=cparams,
    )(x_shift, w_mat)

    # Tiny (n*n_ht, c_out)-sized reduction + BN folding in plain JAX.
    m_total = n * m_img
    s = jnp.sum(stats[:, :, 0, :c_out], axis=(0, 1))
    ss = jnp.sum(stats[:, :, 1, :c_out], axis=(0, 1))
    mean = s / m_total
    # TODO(synk): E[y^2]-E[y]^2 in f32; switch to a shifted/Welford combine if
    # activations ever get large enough for cancellation to matter.
    var = ss / m_total - mean * mean
    inv_std = jax.lax.rsqrt(var + 1e-5)
    scale = (bn_gamma * inv_std).reshape(c_out, 1)
    shift = (bn_beta - mean * bn_gamma * inv_std).reshape(c_out, 1)

    # ---- Pass 2: recomputed conv fused with BN + ReLU, lane-dense output ----
    out = pl.pallas_call(
        functools.partial(_conv_bn_relu_kernel, kh=kh, th=th, w_out=w_out,
                          c_out=c_out),
        out_shape=jax.ShapeDtypeStruct((n, c_out, m_img), jnp.float32),
        grid_spec=pltpu.PrefetchScalarGridSpec(
            num_scalar_prefetch=0,
            grid=(n, n_ht),
            in_specs=[x_spec, w_spec,
                      pl.BlockSpec((c_out, 1), lambda i, t: (0, 0)),
                      pl.BlockSpec((c_out, 1), lambda i, t: (0, 0))],
            out_specs=pl.BlockSpec((None, c_out, th * w_out),
                                   lambda i, t: (i, 0, t)),
        ),
        compiler_params=cparams,
    )(x_shift, w_mat, scale, shift)

    # (n, c_out, h*w) is already channel-major: a free reshape gives NCHW.
    return out.reshape(n, c_out, h_out, w_out)


# ------------------------------ Reference (JAX) ----------------------------- #

def _im2col(x_nhwc, kh, kw, pad):
    n, h, w, c = x_nhwc.shape
    xp = jnp.pad(x_nhwc, ((0, 0), (pad, pad), (pad, pad), (0, 0)))
    cols = [xp[:, i:i + h, j:j + w, :] for i in range(kh) for j in range(kw)]
    patches = jnp.concatenate(cols, axis=-1)
    return patches.reshape(n * h * w, kh * kw * c)


def conv_block_reference(x_nchw, conv_w, conv_b, bn_gamma, bn_beta,
                         kernel_size=3, padding=1):
    n, c_in, h, w = x_nchw.shape
    c_out = conv_w.shape[0]
    x_nhwc = jnp.transpose(x_nchw, (0, 2, 3, 1))
    patches = _im2col(x_nhwc, kernel_size, kernel_size, padding)
    w_mat = jnp.transpose(conv_w, (2, 3, 1, 0)).reshape(-1, c_out)
    y = patches @ w_mat + conv_b[None, :]          # bias kept here on purpose
    mean = jnp.mean(y, axis=0, keepdims=True)
    var = jnp.mean((y - mean) ** 2, axis=0, keepdims=True)
    out = (y - mean) * jax.lax.rsqrt(var + 1e-5) * bn_gamma[None, :] + bn_beta[None, :]
    out = jnp.maximum(out, 0.0).reshape(n, h, w, c_out)
    return jnp.transpose(out, (0, 3, 1, 2))


# ---------------------------------- Main ------------------------------------ #

if __name__ == "__main__":
    key = jax.random.PRNGKey(0)
    k_x, k_w, k_b, k_g, k_bb = jax.random.split(key, 5)

    N, C_IN, H, W = 2, 4, 16, 16
    C_OUT, KSIZE, PAD = 8, 3, 1

    x = jax.random.normal(k_x, (N, C_IN, H, W), dtype=jnp.float32)
    conv_w = jax.random.normal(k_w, (C_OUT, C_IN, KSIZE, KSIZE),
                               dtype=jnp.float32) * 0.1
    conv_b = jax.random.normal(k_b, (C_OUT,), dtype=jnp.float32) * 0.1
    bn_gamma = 1.0 + 0.1 * jax.random.normal(k_g, (C_OUT,), dtype=jnp.float32)
    bn_beta = 0.1 * jax.random.normal(k_bb, (C_OUT,), dtype=jnp.float32)

    out = conv_block(x, conv_w, conv_b, bn_gamma, bn_beta,
                     kernel_size=KSIZE, padding=PAD)
    out = jax.block_until_ready(out)

    ref = conv_block_reference(x, conv_w, conv_b, bn_gamma, bn_beta,
                               kernel_size=KSIZE, padding=PAD)
    assert out.shape == (N, C_OUT, H, W)
    assert jnp.allclose(out, ref, atol=1e-3, rtol=1e-3), "mismatch vs reference"

    print("KERNEL_OK")
</pallas_src>

<mosaic_0001>
module attributes {stable_mosaic.version = 11 : i64} {
  func.func @_conv_stats_kernel(%arg0: i32, %arg1: i32, %arg2: memref<1x18x16x12xf32, #tpu.memory_space<vmem>>, %arg3: memref<3x12x128xf32, #tpu.memory_space<vmem>>, %arg4: memref<1x1x2x128xf32, #tpu.memory_space<vmem>>) attributes {dimension_semantics = [#tpu.dimension_semantics<parallel>, #tpu.dimension_semantics<parallel>], iteration_bounds = array<i64: 2, 1>, scalar_prefetch = 0 : i64, scratch_operands = 0 : i64, tpu.core_type = #tpu.core_type<tc>, window_params = [{transform_indices = @transform_0, window_bounds = array<i64: 1, 18, 16, 12>}, {pipeline_mode = #tpu.pipeline_mode<synchronous>, transform_indices = @transform_1, window_bounds = array<i64: 3, 12, 128>}, {transform_indices = @transform_2, window_bounds = array<i64: 1, 1, 2, 128>}]} {
    %c16_i32 = arith.constant 16 : i32
    %0 = arith.muli %arg1, %c16_i32 : i32
    %c0_i32 = arith.constant 0 : i32
    %1 = arith.addi %0, %c0_i32 : i32
    %c0 = arith.constant 0 : index
    %2 = arith.index_cast %1 : i32 to index
    %c0_0 = arith.constant 0 : index
    %c0_1 = arith.constant 0 : index
    %3 = vector.load %arg2[%c0, %2, %c0_0, %c0_1] : memref<1x18x16x12xf32, #tpu.memory_space<vmem>>, vector<1x16x16x12xf32>
    %4 = vector.shape_cast %3 : vector<1x16x16x12xf32> to vector<16x16x12xf32>
    %5 = vector.shape_cast %4 : vector<16x16x12xf32> to vector<256x12xf32>
    %c0_2 = arith.constant 0 : index
    %c0_3 = arith.constant 0 : index
    %c0_4 = arith.constant 0 : index
    %6 = vector.load %arg3[%c0_2, %c0_3, %c0_4] : memref<3x12x128xf32, #tpu.memory_space<vmem>>, vector<1x12x128xf32>
    %7 = vector.shape_cast %6 : vector<1x12x128xf32> to vector<12x128xf32>
    %cst = arith.constant dense<0.000000e+00> : vector<256x128xf32>
    %8 = tpu.matmul %5, %7, %cst {dimension_numbers = #tpu.dot_dimension_numbers<[1], [0], [0], [1], [0, 0, 1, 1], [], []>} : vector<256x12xf32>, vector<12x128xf32>, vector<256x128xf32> -> vector<256x128xf32>
    %c1_i32 = arith.constant 1 : i32
    %9 = arith.addi %0, %c1_i32 : i32
    %c0_5 = arith.constant 0 : index
    %10 = arith.index_cast %9 : i32 to index
    %c0_6 = arith.constant 0 : index
    %c0_7 = arith.constant 0 : index
    %11 = vector.load %arg2[%c0_5, %10, %c0_6, %c0_7] : memref<1x18x16x12xf32, #tpu.memory_space<vmem>>, vector<1x16x16x12xf32>
    %12 = vector.shape_cast %11 : vector<1x16x16x12xf32> to vector<16x16x12xf32>
    %13 = vector.shape_cast %12 : vector<16x16x12xf32> to vector<256x12xf32>
    %c1 = arith.constant 1 : index
    %c0_8 = arith.constant 0 : index
    %c0_9 = arith.constant 0 : index
    %14 = vector.load %arg3[%c1, %c0_8, %c0_9] : memref<3x12x128xf32, #tpu.memory_space<vmem>>, vector<1x12x128xf32>
    %15 = vector.shape_cast %14 : vector<1x12x128xf32> to vector<12x128xf32>
    %cst_10 = arith.constant dense<0.000000e+00> : vector<256x128xf32>
    %16 = tpu.matmul %13, %15, %cst_10 {dimension_numbers = #tpu.dot_dimension_numbers<[1], [0], [0], [1], [0, 0, 1, 1], [], []>} : vector<256x12xf32>, vector<12x128xf32>, vector<256x128xf32> -> vector<256x128xf32>
    %17 = arith.addf %8, %16 : vector<256x128xf32>
    %c2_i32 = arith.constant 2 : i32
    %18 = arith.addi %0, %c2_i32 : i32
    %c0_11 = arith.constant 0 : index
    %19 = arith.index_cast %18 : i32 to index
    %c0_12 = arith.constant 0 : index
    %c0_13 = arith.constant 0 : index
    %20 = vector.load %arg2[%c0_11, %19, %c0_12, %c0_13] : memref<1x18x16x12xf32, #tpu.memory_space<vmem>>, vector<1x16x16x12xf32>
    %21 = vector.shape_cast %20 : vector<1x16x16x12xf32> to vector<16x16x12xf32>
    %22 = vector.shape_cast %21 : vector<16x16x12xf32> to vector<256x12xf32>
    %c2 = arith.constant 2 : index
    %c0_14 = arith.constant 0 : index
    %c0_15 = arith.constant 0 : index
    %23 = vector.load %arg3[%c2, %c0_14, %c0_15] : memref<3x12x128xf32, #tpu.memory_space<vmem>>, vector<1x12x128xf32>
    %24 = vector.shape_cast %23 : vector<1x12x128xf32> to vector<12x128xf32>
    %cst_16 = arith.constant dense<0.000000e+00> : vector<256x128xf32>
    %25 = tpu.matmul %22, %24, %cst_16 {dimension_numbers = #tpu.dot_dimension_numbers<[1], [0], [0], [1], [0, 0, 1, 1], [], []>} : vector<256x12xf32>, vector<12x128xf32>, vector<256x128xf32> -> vector<256x128xf32>
    %26 = arith.addf %17, %25 : vector<256x128xf32>
    %cst_17 = arith.constant dense<0.000000e+00> : vector<128xf32>
    %27 = vector.multi_reduction <add>, %26, %cst_17 [0] : vector<256x128xf32> to vector<128xf32>
    %28 = vector.shape_cast %27 : vector<128xf32> to vector<1x128xf32>
    %c0_18 = arith.constant 0 : index
    %c0_19 = arith.constant 0 : index
    %c0_20 = arith.constant 0 : index
    %c0_21 = arith.constant 0 : index
    %29 = vector.load %arg4[%c0_18, %c0_19, %c0_20, %c0_21] : memref<1x1x2x128xf32, #tpu.memory_space<vmem>>, vector<1x1x1x128xf32>
    %30 = vector.shape_cast %29 : vector<1x1x1x128xf32> to vector<1x128xf32>
    %31 = vector.shape_cast %28 : vector<1x128xf32> to vector<1x1x1x128xf32>
    tpu.vector_store %arg4[%c0_18, %c0_19, %c0_20, %c0_21], %31 {strides = array<i32>} : memref<1x1x2x128xf32, #tpu.memory_space<vmem>>, vector<1x1x1x128xf32>,
    %32 = arith.mulf %26, %26 : vector<256x128xf32>
    %cst_22 = arith.constant dense<0.000000e+00> : vector<128xf32>
    %33 = vector.multi_reduction <add>, %32, %cst_22 [0] : vector<256x128xf32> to vector<128xf32>
    %34 = vector.shape_cast %33 : vector<128xf32> to vector<1x128xf32>
    %c0_23 = arith.constant 0 : index
    %c0_24 = arith.constant 0 : index
    %c1_25 = arith.constant 1 : index
    %c0_26 = arith.constant 0 : index
    %35 = vector.load %arg4[%c0_23, %c0_24, %c1_25, %c0_26] : memref<1x1x2x128xf32, #tpu.memory_space<vmem>>, vector<1x1x1x128xf32>
    %36 = vector.shape_cast %35 : vector<1x1x1x128xf32> to vector<1x128xf32>
    %37 = vector.shape_cast %34 : vector<1x128xf32> to vector<1x1x1x128xf32>
    tpu.vector_store %arg4[%c0_23, %c0_24, %c1_25, %c0_26], %37 {strides = array<i32>} : memref<1x1x2x128xf32, #tpu.memory_space<vmem>>, vector<1x1x1x128xf32>,
    return
  }
  func.func @transform_0(%arg0: i32, %arg1: i32) -> (i32, i32, i32, i32) {
    %c0_i32 = arith.constant 0 : i32
    %c0_i32_0 = arith.constant 0 : i32
    %c0_i32_1 = arith.constant 0 : i32
    %c0_i32_2 = arith.constant 0 : i32
    return %arg0, %c0_i32, %c0_i32_0, %c0_i32_1 : i32, i32, i32, i32
  }
  func.func @transform_1(%arg0: i32, %arg1: i32) -> (i32, i32, i32) {
    %c0_i32 = arith.constant 0 : i32
    %c0_i32_0 = arith.constant 0 : i32
    %c0_i32_1 = arith.constant 0 : i32
    %c0_i32_2 = arith.constant 0 : i32
    return %c0_i32, %c0_i32_0, %c0_i32_1 : i32, i32, i32
  }
  func.func @transform_2(%arg0: i32, %arg1: i32) -> (i32, i32, i32, i32) {
    %c0_i32 = arith.constant 0 : i32
    %c0_i32_0 = arith.constant 0 : i32
    %c0_i32_1 = arith.constant 0 : i32
    return %arg0, %arg1, %c0_i32, %c0_i32_0 : i32, i32, i32, i32
  }
}

module attributes {stable_mosaic.version = 11 : i64} {
  func.func @_conv_bn_relu_kernel(%arg0: i32, %arg1: i32, %arg2: memref<1x18x16x12xf32, #tpu.memory_space<vmem>>, %arg3: memref<3x12x128xf32, #tpu.memory_space<vmem>>, %arg4: memref<8x1xf32, #tpu.memory_space<vmem>>, %arg5: memref<8x1xf32, #tpu.memory_space<vmem>>, %arg6: memref<1x8x256xf32, #tpu.memory_space<vmem>>) attributes {dimension_semantics = [#tpu.dimension_semantics<parallel>, #tpu.dimension_semantics<parallel>], iteration_bounds = array<i64: 2, 1>, scalar_prefetch = 0 : i64, scratch_operands = 0 : i64, tpu.core_type = #tpu.core_type<tc>, window_params = [{transform_indices = @transform_0, window_bounds = array<i64: 1, 18, 16, 12>}, {pipeline_mode = #tpu.pipeline_mode<synchronous>, transform_indices = @transform_1, window_bounds = array<i64: 3, 12, 128>}, {pipeline_mode = #tpu.pipeline_mode<synchronous>, transform_indices = @transform_2, window_bounds = array<i64: 8, 1>}, {pipeline_mode = #tpu.pipeline_mode<synchronous>, transform_indices = @transform_3, window_bounds = array<i64: 8, 1>}, {transform_indices = @transform_4, window_bounds = array<i64: 1, 8, 256>}]} {
    %c16_i32 = arith.constant 16 : i32
    %0 = arith.muli %arg1, %c16_i32 : i32
    %c0_i32 = arith.constant 0 : i32
    %1 = arith.addi %0, %c0_i32 : i32
    %c0 = arith.constant 0 : index
    %2 = arith.index_cast %1 : i32 to index
    %c0_0 = arith.constant 0 : index
    %c0_1 = arith.constant 0 : index
    %3 = vector.load %arg2[%c0, %2, %c0_0, %c0_1] : memref<1x18x16x12xf32, #tpu.memory_space<vmem>>, vector<1x16x16x12xf32>
    %4 = vector.shape_cast %3 : vector<1x16x16x12xf32> to vector<16x16x12xf32>
    %5 = vector.shape_cast %4 : vector<16x16x12xf32> to vector<256x12xf32>
    %c0_2 = arith.constant 0 : index
    %c0_3 = arith.constant 0 : index
    %c0_4 = arith.constant 0 : index
    %6 = vector.load %arg3[%c0_2, %c0_3, %c0_4] : memref<3x12x128xf32, #tpu.memory_space<vmem>>, vector<1x12x128xf32>
    %7 = vector.shape_cast %6 : vector<1x12x128xf32> to vector<12x128xf32>
    %cst = arith.constant dense<0.000000e+00> : vector<256x128xf32>
    %8 = tpu.matmul %5, %7, %cst {dimension_numbers = #tpu.dot_dimension_numbers<[1], [0], [0], [1], [0, 0, 1, 1], [], []>} : vector<256x12xf32>, vector<12x128xf32>, vector<256x128xf32> -> vector<256x128xf32>
    %c1_i32 = arith.constant 1 : i32
    %9 = arith.addi %0, %c1_i32 : i32
    %c0_5 = arith.constant 0 : index
    %10 = arith.index_cast %9 : i32 to index
    %c0_6 = arith.constant 0 : index
    %c0_7 = arith.constant 0 : index
    %11 = vector.load %arg2[%c0_5, %10, %c0_6, %c0_7] : memref<1x18x16x12xf32, #tpu.memory_space<vmem>>, vector<1x16x16x12xf32>
    %12 = vector.shape_cast %11 : vector<1x16x16x12xf32> to vector<16x16x12xf32>
    %13 = vector.shape_cast %12 : vector<16x16x12xf32> to vector<256x12xf32>
    %c1 = arith.constant 1 : index
    %c0_8 = arith.constant 0 : index
    %c0_9 = arith.constant 0 : index
    %14 = vector.load %arg3[%c1, %c0_8, %c0_9] : memref<3x12x128xf32, #tpu.memory_space<vmem>>, vector<1x12x128xf32>
    %15 = vector.shape_cast %14 : vector<1x12x128xf32> to vector<12x128xf32>
    %cst_10 = arith.constant dense<0.000000e+00> : vector<256x128xf32>
    %16 = tpu.matmul %13, %15, %cst_10 {dimension_numbers = #tpu.dot_dimension_numbers<[1], [0], [0], [1], [0, 0, 1, 1], [], []>} : vector<256x12xf32>, vector<12x128xf32>, vector<256x128xf32> -> vector<256x128xf32>
    %17 = arith.addf %8, %16 : vector<256x128xf32>
    %c2_i32 = arith.constant 2 : i32
    %18 = arith.addi %0, %c2_i32 : i32
    %c0_11 = arith.constant 0 : index
    %19 = arith.index_cast %18 : i32 to index
    %c0_12 = arith.constant 0 : index
    %c0_13 = arith.constant 0 : index
    %20 = vector.load %arg2[%c0_11, %19, %c0_12, %c0_13] : memref<1x18x16x12xf32, #tpu.memory_space<vmem>>, vector<1x16x16x12xf32>
    %21 = vector.shape_cast %20 : vector<1x16x16x12xf32> to vector<16x16x12xf32>
    %22 = vector.shape_cast %21 : vector<16x16x12xf32> to vector<256x12xf32>
    %c2 = arith.constant 2 : index
    %c0_14 = arith.constant 0 : index
    %c0_15 = arith.constant 0 : index
    %23 = vector.load %arg3[%c2, %c0_14, %c0_15] : memref<3x12x128xf32, #tpu.memory_space<vmem>>, vector<1x12x128xf32>
    %24 = vector.shape_cast %23 : vector<1x12x128xf32> to vector<12x128xf32>
    %cst_16 = arith.constant dense<0.000000e+00> : vector<256x128xf32>
    %25 = tpu.matmul %22, %24, %cst_16 {dimension_numbers = #tpu.dot_dimension_numbers<[1], [0], [0], [1], [0, 0, 1, 1], [], []>} : vector<256x12xf32>, vector<12x128xf32>, vector<256x128xf32> -> vector<256x128xf32>
    %26 = arith.addf %17, %25 : vector<256x128xf32>
    %27 = vector.extract_strided_slice %26 {offsets = [0, 0], sizes = [256, 8], strides = [1, 1]} : vector<256x128xf32> to vector<256x8xf32>
    %28 = tpu.transpose %27, [1, 0] : vector<256x8xf32> -> vector<8x256xf32>
    %c0_17 = arith.constant 0 : index
    %c0_18 = arith.constant 0 : index
    %29 = vector.load %arg4[%c0_17, %c0_18] : memref<8x1xf32, #tpu.memory_space<vmem>>, vector<8x1xf32>
    %30 = vector.broadcast %29 : vector<8x1xf32> to vector<8x256xf32>
    %31 = arith.mulf %28, %30 : vector<8x256xf32>
    %c0_19 = arith.constant 0 : index
    %c0_20 = arith.constant 0 : index
    %32 = vector.load %arg5[%c0_19, %c0_20] : memref<8x1xf32, #tpu.memory_space<vmem>>, vector<8x1xf32>
    %33 = vector.broadcast %32 : vector<8x1xf32> to vector<8x256xf32>
    %34 = arith.addf %31, %33 : vector<8x256xf32>
    %cst_21 = arith.constant 0.000000e+00 : f32
    %35 = vector.broadcast %cst_21 : f32 to vector<8x256xf32>
    %36 = arith.maximumf %34, %35 : vector<8x256xf32>
    %c0_22 = arith.constant 0 : index
    %c0_23 = arith.constant 0 : index
    %c0_24 = arith.constant 0 : index
    %37 = vector.load %arg6[%c0_22, %c0_23, %c0_24] : memref<1x8x256xf32, #tpu.memory_space<vmem>>, vector<1x8x256xf32>
    %38 = vector.shape_cast %37 : vector<1x8x256xf32> to vector<8x256xf32>
    %39 = vector.shape_cast %36 : vector<8x256xf32> to vector<1x8x256xf32>
    tpu.vector_store %arg6[%c0_22, %c0_23, %c0_24], %39 {strides = array<i32>} : memref<1x8x256xf32, #tpu.memory_space<vmem>>, vector<1x8x256xf32>,
    return
  }
  func.func @transform_0(%arg0: i32, %arg1: i32) -> (i32, i32, i32, i32) {
    %c0_i32 = arith.constant 0 : i32
    %c0_i32_0 = arith.constant 0 : i32
    %c0_i32_1 = arith.constant 0 : i32
    %c0_i32_2 = arith.constant 0 : i32
    return %arg0, %c0_i32, %c0_i32_0, %c0_i32_1 : i32, i32, i32, i32
  }
  func.func @transform_1(%arg0: i32, %arg1: i32) -> (i32, i32, i32) {
    %c0_i32 = arith.constant 0 : i32
    %c0_i32_0 = arith.constant 0 : i32
    %c0_i32_1 = arith.constant 0 : i32
    %c0_i32_2 = arith.constant 0 : i32
    return %c0_i32, %c0_i32_0, %c0_i32_1 : i32, i32, i32
  }
  func.func @transform_2(%arg0: i32, %arg1: i32) -> (i32, i32) {
    %c0_i32 = arith.constant 0 : i32
    %c0_i32_0 = arith.constant 0 : i32
    %c0_i32_1 = arith.constant 0 : i32
    return %c0_i32, %c0_i32_0 : i32, i32
  }
  func.func @transform_3(%arg0: i32, %arg1: i32) -> (i32, i32) {
    %c0_i32 = arith.constant 0 : i32
    %c0_i32_0 = arith.constant 0 : i32
    %c0_i32_1 = arith.constant 0 : i32
    return %c0_i32, %c0_i32_0 : i32, i32
  }
  func.func @transform_4(%arg0: i32, %arg1: i32) -> (i32, i32, i32) {
    %c0_i32 = arith.constant 0 : i32
    %c0_i32_0 = arith.constant 0 : i32
    return %arg0, %c0_i32, %arg1 : i32, i32, i32
  }
}

</mosaic_0001>

<bundles_post_ra>
// kernel: conv_block.2
= control target key start
LH: loop header
LB: loop body
LE: loop exit
PB: predicated region body
PF: predicated region fallthrough
CT: control target
= control target key end

     0   :  { %s1972_s9 = smov 0   ;;  %s1974_s10 = smov 0   ;;  %s2342_s0 = inlined_call_operand.vmem [shape: f32[2,18,16,12], index: 0, kind: input, shape index: {}]   ;;  %s2343_s1 = inlined_call_operand.vmem [shape: f32[3,12,128], index: 1, kind: input, shape index: {}]   ;;  %s2344_s2 = inlined_call_operand.vmem [shape: f32[2,1,2,128], index: 2, kind: output, shape index: {}]  }
   0x1   :  { %s1976_s11 = smov 0  }
   0x2 LB: > { %s24_s12 = sadd.s32 1, %s1951_s10  ;;  %p1474_p0 = scmp.ge.s32.totalorder %s1955_s11, 1  ;;  %s1955_s11 = sphi %s1976_s11, %s12_s11   ;;  %s1951_s10 = sphi %s1974_s10, %s2346_s10   ;;  %s1947_s9 = sphi %s1972_s9, %s2345_s9  }
   0x3   : > { %p26_p1 = scmp.ge.s32.totalorder %s24_s12, 2  ;;  %p126_p2 = scmp.lt.s32.totalorder %s1955_s11, 3 }
   0x5   : > { %s2348_s12 = smov (%p26_p1, %s24_s12), 0  ;;  %p127_p3 = pnand %p1474_p0, %p126_p2 }
   0x6   : > { %p150_p4 = scmp.lt.s32.totalorder (!%p127_p3), %s1947_s9, 1 }
   0x7   : > { %130 = sbr.rel (%p127_p3) target bundleno = 329 (0x149), region = 28 }
   0xc   : > { %v1510_v0 = vld [vmem:[%s2343_s1 + $0x18] sm:$0xf]  ;;  %vm334_vm0 = vcmask 1043456   ;;  %v1509_v1 = vld [vmem:[%s2343_s1 + $0x10] sm:$0xff]  ;;  %s2350_s9 = smov (!%p150_p4, %s1947_s9), 1  ;;  %vm237_vm1 = vcmask 97280  }
   0xd   : > { %1904 = vmatprep.subr.msk.mxu1 %vm334_vm0, %v1510_v0  ;;  %1748 = vmatprep.subr.msk.mxu0 %vm334_vm0, %v1510_v0  ;;  %v198_v2 = vld [vmem:[%s2343_s1 + $0x8] sm:$0xf]  ;;  %s1908_s21 = smul.u32 288, %s2350_s9  ;;  %v197_v10 = vld [vmem:[%s2343_s1] sm:$0xff]  ;;  %s1476_s29 = sshll.u32 %s2350_s9, 1 }
   0xe   : > { %1906 = vmatpush3.msk.msra.mxu1 %vm334_vm0, %v1510_v0  ;;  %1749 = vmatpush3.msk.msra.mxu0 %vm334_vm0, %v1510_v0  ;;  %v1610_v3 = vld [vmem:[%s2343_s1 + $0x28] sm:$0xf]  ;;  %v1609_v11 = vld [vmem:[%s2343_s1 + $0x20] sm:$0xff]  ;;  %s161_s4 = scalar_lea.vmem %s2344_s2, %s1476_s29 }
   0xf   : > { %1905 = vmatprep.subr.mxu1 %v1509_v1  ;;  %1750 = vmatprep.subr.mxu0 %v1509_v1  ;;  %s2014_s24 = scalar_lea.vmem %s2342_s0, %s1908_s21 }
  0x10   : > { %1907 = vmatpush3.msra.mxu1 %v1509_v1  ;;  %1751 = vmatpush3.msra.mxu0 %v1509_v1  ;;  %v2017_v4 = vld [vmem:[%s2014_s24 + $0x10] sm:$0xff]  ;;  %v2023_v6 = vld [vmem:[%s2014_s24 + $0x18] sm:$0xff]  ;;  %v2033_v8 = vld [vmem:[%s2014_s24 + $0x20] sm:$0xff] }
  0x11   : > { %1800 = vmatprep.subr.msk.mxu1 %vm334_vm0, %v198_v2  ;;  %1852 = vmatprep.subr.msk.mxu0 %vm334_vm0, %v1610_v3  ;;  %v2020_v5 = vld [vmem:[%s2014_s24 + $0x90] sm:$0xff]  ;;  %v2030_v7 = vld [vmem:[%s2014_s24 + $0x98] sm:$0xff]  ;;  %v2036_v9 = vld [vmem:[%s2014_s24 + $0xa0] sm:$0xff] }
  0x12   : > { %1752 = vmatprep.mubr.msk.f32.mxu0 %vm237_vm1, %v2017_v4  ;;  %1776 = vmatprep.mubr.msk.f32.mxu1 %vm237_vm1, %v2020_v5  ;;  %v2051_v12 = vld [vmem:[%s2014_s24 + $0x28] sm:$0xff]  ;;  %v2061_v14 = vld [vmem:[%s2014_s24 + $0x30] sm:$0xff]  ;;  %v1482_v16 = vld [vmem:[%s2014_s24 + $0x38] sm:$0xff] }
  0x13   : > { %1753 = vmatmul.mubr.msk.f32.vlgmr.msra.gmra.mxu0 %vm237_vm1, %v2023_v6  ;;  %1777 = vmatmul.mubr.msk.f32.vlgmr.msra.gmra.mxu1 %vm237_vm1, %v2030_v7  ;;  %v2054_v13 = vld [vmem:[%s2014_s24 + $0xa8] sm:$0xff]  ;;  %v2064_v15 = vld [vmem:[%s2014_s24 + $0xb0] sm:$0xff]  ;;  %v2076_v17 = vld [vmem:[%s2014_s24 + $0xb8] sm:$0xff] }
  0x14   : > { %1801 = vmatpush3.msk.msra.mxu1 %vm334_vm0, %v198_v2  ;;  %1853 = vmatpush3.msk.msra.mxu0 %vm334_vm0, %v1610_v3  ;;  %v1483_v18 = vld [vmem:[%s2014_s24 + $0x40] sm:$0xff]  ;;  %v1484_v20 = vld [vmem:[%s2014_s24 + $0x48] sm:$0xff]  ;;  %v1485_v22 = vld [vmem:[%s2014_s24 + $0x50] sm:$0xff] }
  0x15   : > { %1755 = vmatprep.mubr.msk.f32.mxu0 %vm237_vm1, %v2033_v8  ;;  %1779 = vmatprep.mubr.msk.f32.mxu1 %vm237_vm1, %v2036_v9  ;;  %v2080_v19 = vld [vmem:[%s2014_s24 + $0xc0] sm:$0xff]  ;;  %v2090_v21 = vld [vmem:[%s2014_s24 + $0xc8] sm:$0xff]  ;;  %v2094_v23 = vld [vmem:[%s2014_s24 + $0xd0] sm:$0xff] }
  0x16   : > { %1802 = vmatprep.subr.mxu1 %v197_v10  ;;  %1854 = vmatprep.subr.mxu0 %v1609_v11  ;;  %v1486_v24 = vld [vmem:[%s2014_s24 + $0x58] sm:$0xff]  ;;  %v1487_v26 = vld [vmem:[%s2014_s24 + $0x60] sm:$0xff]  ;;  %v1488_v28 = vld [vmem:[%s2014_s24 + $0x68] sm:$0xff] }
  0x17   : > { %1756 = vmatmul.mubr.msk.f32.gmra.mxu0 %vm237_vm1, %v2051_v12  ;;  %1780 = vmatmul.mubr.msk.f32.gmra.mxu1 %vm237_vm1, %v2054_v13  ;;  %v2104_v25 = vld [vmem:[%s2014_s24 + $0xd8] sm:$0xff]  ;;  %v2108_v27 = vld [vmem:[%s2014_s24 + $0xe0] sm:$0xff]  ;;  %v2118_v29 = vld [vmem:[%s2014_s24 + $0xe8] sm:$0xff] }
  0x18   : > { %1758 = vmatprep.mubr.msk.f32.mxu0 %vm237_vm1, %v2061_v14  ;;  %1782 = vmatprep.mubr.msk.f32.mxu1 %vm237_vm1, %v2064_v15  ;;  %v1489_v30 = vld [vmem:[%s2014_s24 + $0x70] sm:$0xff]  ;;  %v1490_v32 = vld [vmem:[%s2014_s24 + $0x78] sm:$0xff]  ;;  %v1491_v34 = vld [vmem:[%s2014_s24 + $0x80] sm:$0xff] }
  0x19   : > { %1803 = vmatpush3.msra.mxu1 %v197_v10  ;;  %1855 = vmatpush3.msra.mxu0 %v1609_v11  ;;  %v2122_v31 = vld [vmem:[%s2014_s24 + $0xf0] sm:$0xff]  ;;  %v2132_v33 = vld [vmem:[%s2014_s24 + $0xf8] sm:$0xff]  ;;  %v2136_v35 = vld [vmem:[%s2014_s24 + $0x100] sm:$0xff] }
  0x1a   : > { %v1492_v36 = vld [vmem:[%s2014_s24 + $0x88] sm:$0xff]  ;;  %v165_v38 = vld [vmem:[%s2014_s24] sm:$0xff]  ;;  %v1607_v40 = vld [vmem:[%s2014_s24 + $0x110] sm:$0xff] }
  0x1b   : > { %1759 = vmatmul.mubr.msk.f32.gmra.mxu0 %vm237_vm1, %v1482_v16  ;;  %1783 = vmatmul.mubr.msk.f32.gmra.mxu1 %vm237_vm1, %v2076_v17  ;;  %v2146_v37 = vld [vmem:[%s2014_s24 + $0x108] sm:$0xff]  ;;  %v1608_v41 = vld [vmem:[%s2014_s24 + $0x118] sm:$0xff] }
  0x1c   : > { %1761 = vmatprep.mubr.msk.f32.mxu0 %vm237_vm1, %v1483_v18  ;;  %1785 = vmatprep.mubr.msk.f32.mxu1 %vm237_vm1, %v2080_v19  ;;  %v166_v39 = vld [vmem:[%s2014_s24 + $0x8] sm:$0xff] }
  0x1f   : > { %1762 = vmatmul.mubr.msk.f32.gmra.mxu0 %vm237_vm1, %v1484_v20  ;;  %1786 = vmatmul.mubr.msk.f32.gmra.mxu1 %vm237_vm1, %v2090_v21 }
  0x20   : > { %1764 = vmatprep.mubr.msk.f32.mxu0 %vm237_vm1, %v1485_v22  ;;  %1788 = vmatprep.mubr.msk.f32.mxu1 %vm237_vm1, %v2094_v23 }
  0x23   : > { %1765 = vmatmul.mubr.msk.f32.gmra.mxu0 %vm237_vm1, %v1486_v24  ;;  %1789 = vmatmul.mubr.msk.f32.gmra.mxu1 %vm237_vm1, %v2104_v25 }
  0x24   : > { %1767 = vmatprep.mubr.msk.f32.mxu0 %vm237_vm1, %v1487_v26  ;;  %1791 = vmatprep.mubr.msk.f32.mxu1 %vm237_vm1, %v2108_v27 }
  0x27   : > { %1768 = vmatmul.mubr.msk.f32.gmra.mxu0 %vm237_vm1, %v1488_v28  ;;  %1792 = vmatmul.mubr.msk.f32.gmra.mxu1 %vm237_vm1, %v2118_v29 }
  0x28   : > { %1770 = vmatprep.mubr.msk.f32.mxu0 %vm237_vm1, %v1489_v30  ;;  %1794 = vmatprep.mubr.msk.f32.mxu1 %vm237_vm1, %v2122_v31 }
  0x2b   : > { %1771 = vmatmul.mubr.msk.f32.gmra.mxu0 %vm237_vm1, %v1490_v32  ;;  %1795 = vmatmul.mubr.msk.f32.gmra.mxu1 %vm237_vm1, %v2132_v33 }
  0x2c   : > { %1773 = vmatprep.mubr.msk.f32.mxu0 %vm237_vm1, %v1491_v34  ;;  %1797 = vmatprep.mubr.msk.f32.mxu1 %vm237_vm1, %v2136_v35 }
  0x2f   : > { %1774 = vmatmul.mubr.msk.f32.gmra.mxu0 %vm237_vm1, %v1492_v36  ;;  %1798 = vmatmul.mubr.msk.f32.gmra.mxu1 %vm237_vm1, %v2146_v37 }
  0x30   : > { %1804 = vmatprep.mubr.msk.f32.mxu1 %vm237_vm1, %v165_v38  ;;  %1856 = vmatprep.mubr.msk.f32.mxu0 %vm237_vm1, %v2033_v8 }
  0x33   : > { %1805 = vmatmul.mubr.msk.f32.vlgmr.msra.gmra.mxu1 %vm237_vm1, %v166_v39  ;;  %1857 = vmatmul.mubr.msk.f32.vlgmr.msra.gmra.mxu0 %vm237_vm1, %v2051_v12 }
  0x34   : > { %1807 = vmatprep.mubr.msk.f32.mxu1 %vm237_vm1, %v2017_v4  ;;  %1859 = vmatprep.mubr.msk.f32.mxu0 %vm237_vm1, %v2061_v14 }
  0x37   : > { %1808 = vmatmul.mubr.msk.f32.gmra.mxu1 %vm237_vm1, %v2023_v6  ;;  %1860 = vmatmul.mubr.msk.f32.gmra.mxu0 %vm237_vm1, %v1482_v16 }
  0x38   : > { %1810 = vmatprep.mubr.msk.f32.mxu1 %vm237_vm1, %v2033_v8  ;;  %1862 = vmatprep.mubr.msk.f32.mxu0 %vm237_vm1, %v1483_v18 }
  0x3b   : > { %1811 = vmatmul.mubr.msk.f32.gmra.mxu1 %vm237_vm1, %v2051_v12  ;;  %1863 = vmatmul.mubr.msk.f32.gmra.mxu0 %vm237_vm1, %v1484_v20 }
  0x3c   : > { %1813 = vmatprep.mubr.msk.f32.mxu1 %vm237_vm1, %v2061_v14  ;;  %1865 = vmatprep.mubr.msk.f32.mxu0 %vm237_vm1, %v1485_v22 }
  0x3f   : > { %1814 = vmatmul.mubr.msk.f32.gmra.mxu1 %vm237_vm1, %v1482_v16  ;;  %1866 = vmatmul.mubr.msk.f32.gmra.mxu0 %vm237_vm1, %v1486_v24 }
  0x40   : > { %1816 = vmatprep.mubr.msk.f32.mxu1 %vm237_vm1, %v1483_v18  ;;  %1868 = vmatprep.mubr.msk.f32.mxu0 %vm237_vm1, %v1487_v26 }
  0x43   : > { %1817 = vmatmul.mubr.msk.f32.gmra.mxu1 %vm237_vm1, %v1484_v20  ;;  %1869 = vmatmul.mubr.msk.f32.gmra.mxu0 %vm237_vm1, %v1488_v28 }
  0x44   : > { %1819 = vmatprep.mubr.msk.f32.mxu1 %vm237_vm1, %v1485_v22  ;;  %1871 = vmatprep.mubr.msk.f32.mxu0 %vm237_vm1, %v1489_v30 }
  0x47   : > { %1820 = vmatmul.mubr.msk.f32.gmra.mxu1 %vm237_vm1, %v1486_v24  ;;  %1872 = vmatmul.mubr.msk.f32.gmra.mxu0 %vm237_vm1, %v1490_v32 }
  0x48   : > { %1822 = vmatprep.mubr.msk.f32.mxu1 %vm237_vm1, %v1487_v26  ;;  %1874 = vmatprep.mubr.msk.f32.mxu0 %vm237_vm1, %v1491_v34 }
  0x4b   : > { %1823 = vmatmul.mubr.msk.f32.gmra.mxu1 %vm237_vm1, %v1488_v28  ;;  %1875 = vmatmul.mubr.msk.f32.gmra.mxu0 %vm237_vm1, %v1492_v36 }
  0x4c   : > { %1825 = vmatprep.mubr.msk.f32.mxu1 %vm237_vm1, %v1489_v30  ;;  %1877 = vmatprep.mubr.msk.f32.mxu0 %vm237_vm1, %v2020_v5 }
  0x4f   : > { %1826 = vmatmul.mubr.msk.f32.gmra.mxu1 %vm237_vm1, %v1490_v32  ;;  %1878 = vmatmul.mubr.msk.f32.gmra.mxu0 %vm237_vm1, %v2030_v7 }
  0x50   : > { %1828 = vmatprep.mubr.msk.f32.mxu1 %vm237_vm1, %v1491_v34  ;;  %1880 = vmatprep.mubr.msk.f32.mxu0 %vm237_vm1, %v2036_v9 }
  0x53   : > { %1829 = vmatmul.mubr.msk.f32.gmra.mxu1 %vm237_vm1, %v1492_v36  ;;  %1881 = vmatmul.mubr.msk.f32.gmra.mxu0 %vm237_vm1, %v2054_v13 }
  0x54   : > { %1831 = vmatprep.mubr.msk.f32.mxu1 %vm237_vm1, %v2020_v5  ;;  %1883 = vmatprep.mubr.msk.f32.mxu0 %vm237_vm1, %v2064_v15 }
  0x57   : > { %1832 = vmatmul.mubr.msk.f32.gmra.mxu1 %vm237_vm1, %v2030_v7  ;;  %1884 = vmatmul.mubr.msk.f32.gmra.mxu0 %vm237_vm1, %v2076_v17 }
  0x58   : > { %1834 = vmatprep.mubr.msk.f32.mxu1 %vm237_vm1, %v2036_v9  ;;  %1886 = vmatprep.mubr.msk.f32.mxu0 %vm237_vm1, %v2080_v19 }
  0x5b   : > { %1835 = vmatmul.mubr.msk.f32.gmra.mxu1 %vm237_vm1, %v2054_v13  ;;  %1887 = vmatmul.mubr.msk.f32.gmra.mxu0 %vm237_vm1, %v2090_v21 }
  0x5c   : > { %1837 = vmatprep.mubr.msk.f32.mxu1 %vm237_vm1, %v2064_v15  ;;  %1889 = vmatprep.mubr.msk.f32.mxu0 %vm237_vm1, %v2094_v23 }
  0x5f   : > { %1838 = vmatmul.mubr.msk.f32.gmra.mxu1 %vm237_vm1, %v2076_v17  ;;  %1890 = vmatmul.mubr.msk.f32.gmra.mxu0 %vm237_vm1, %v2104_v25 }
  0x60   : > { %1840 = vmatprep.mubr.msk.f32.mxu1 %vm237_vm1, %v2080_v19  ;;  %1892 = vmatprep.mubr.msk.f32.mxu0 %vm237_vm1, %v2108_v27 }
  0x63   : > { %1841 = vmatmul.mubr.msk.f32.gmra.mxu1 %vm237_vm1, %v2090_v21  ;;  %1893 = vmatmul.mubr.msk.f32.gmra.mxu0 %vm237_vm1, %v2118_v29 }
  0x64   : > { %1843 = vmatprep.mubr.msk.f32.mxu1 %vm237_vm1, %v2094_v23  ;;  %1895 = vmatprep.mubr.msk.f32.mxu0 %vm237_vm1, %v2122_v31 }
  0x67   : > { %1844 = vmatmul.mubr.msk.f32.gmra.mxu1 %vm237_vm1, %v2104_v25  ;;  %1896 = vmatmul.mubr.msk.f32.gmra.mxu0 %vm237_vm1, %v2132_v33 }
  0x68   : > { %1846 = vmatprep.mubr.msk.f32.mxu1 %vm237_vm1, %v2108_v27  ;;  %1898 = vmatprep.mubr.msk.f32.mxu0 %vm237_vm1, %v2136_v35 }
  0x6b   : > { %1847 = vmatmul.mubr.msk.f32.gmra.mxu1 %vm237_vm1, %v2118_v29  ;;  %1899 = vmatmul.mubr.msk.f32.gmra.mxu0 %vm237_vm1, %v2146_v37 }
  0x6c   : > { %1849 = vmatprep.mubr.msk.f32.mxu1 %vm237_vm1, %v2122_v31  ;;  %1901 = vmatprep.mubr.msk.f32.mxu0 %vm237_vm1, %v1607_v40 }
  0x6f   : > { %1850 = vmatmul.mubr.msk.f32.gmra.mxu1 %vm237_vm1, %v2132_v33  ;;  %1902 = vmatmul.mubr.msk.f32.gmra.mxu0 %vm237_vm1, %v1608_v41 }
  0xd3   : > { %v1754_v42 = vpop.f32.mrf.mxu0  ;;  %v2257_v43 = vpop.f32.mrf.mxu1 }
  0xd5   : > { %v404_v44 = vpop.f32.mrf.mxu0  ;;  %v2259_v45 = vpop.f32.mrf.mxu1 }
  0xd7   : > { %v1757_v46 = vpop.f32.mrf.mxu0  ;;  %v2261_v47 = vpop.f32.mrf.mxu1 }
  0xd9   : > { %v414_v48 = vpop.f32.mrf.mxu0  ;;  %v2263_v49 = vpop.f32.mrf.mxu1 }
  0xdb   : > { %v1760_v50 = vpop.f32.mrf.mxu0  ;;  %v2265_v51 = vpop.f32.mrf.mxu1 }
  0xdd   : > { %v424_v52 = vpop.f32.mrf.mxu0  ;;  %v2267_v53 = vpop.f32.mrf.mxu1 }
  0xdf   : > { %v1763_v54 = vpop.f32.mrf.mxu0  ;;  %v2269_v55 = vpop.f32.mrf.mxu1 }
  0xe1   : > { %v434_v56 = vpop.f32.mrf.mxu0  ;;  %v2271_v57 = vpop.f32.mrf.mxu1 }
  0xe3   : > { %v2273_v58 = vpop.f32.mrf.mxu0  ;;  %v2275_v59 = vpop.f32.mrf.mxu1 }
  0xe5   : > { %v2277_v60 = vpop.f32.mrf.mxu0  ;;  %v2279_v61 = vpop.f32.mrf.mxu1 }
  0xe7   : > { %v2281_v62 = vpop.f32.mrf.mxu0  ;;  %v2283_v63 = vpop.f32.mrf.mxu1 }
  0xe9   : > { %v2285_v0 = vpop.f32.mrf.mxu0  ;;  %v2287_v1 = vpop.f32.mrf.mxu1 }
  0xeb   : > { %v2289_v2 = vpop.f32.mrf.mxu0  ;;  %v2291_v3 = vpop.f32.mrf.mxu1 }
  0xed   : > { %v2293_v4 = vpop.f32.mrf.mxu0  ;;  %v2295_v5 = vpop.f32.mrf.mxu1 }
  0xef   : > { %v2297_v6 = vpop.f32.mrf.mxu0  ;;  %v2299_v7 = vpop.f32.mrf.mxu1 }
  0xf1   : > { %v2301_v8 = vpop.f32.mrf.mxu0  ;;  %v2303_v9 = vpop.f32.mrf.mxu1 }
  0xf3   : > { %v1806_v10 = vpop.f32.mrf.mxu1  ;;  %v1858_v11 = vpop.f32.mrf.mxu0 }
  0xf4   : > { %v734_v12 = vadd.f32 %v1806_v10, %v1754_v42 }
  0xf5   : > { %v728_v13 = vpop.f32.mrf.mxu1  ;;  %v1090_v14 = vpop.f32.mrf.mxu0 }
  0xf6   : > { %v729_v15 = vadd.f32 %v728_v13, %v404_v44  ;;  %v1250_v16 = vadd.f32 %v1858_v11, %v734_v12 }
  0xf7   : > { %v1809_v17 = vpop.f32.mrf.mxu1  ;;  %v1861_v18 = vpop.f32.mrf.mxu0 }
  0xf8   : > { %v1249_v19 = vadd.f32 %v1090_v14, %v729_v15  ;;  %v744_v20 = vadd.f32 %v1809_v17, %v1757_v46  ;;  %v1320_v25 = vmul.f32 %v1250_v16, %v1250_v16 }
  0xf9   : > { %v738_v21 = vpop.f32.mrf.mxu1  ;;  %v1100_v22 = vpop.f32.mrf.mxu0 }
  0xfa   : > { %v1319_v23 = vmul.f32 %v1249_v19, %v1249_v19  ;;  %v739_v24 = vadd.f32 %v738_v21, %v414_v48  ;;  %v1281_v28 = vadd.f32 %v1250_v16, %v1249_v19  ;;  %v1252_v29 = vadd.f32 %v1861_v18, %v744_v20 }
  0xfb   : > { %v1812_v26 = vpop.f32.mrf.mxu1  ;;  %v1864_v27 = vpop.f32.mrf.mxu0 }
  0xfc   : > { %v1251_v30 = vadd.f32 %v1100_v22, %v739_v24  ;;  %v754_v31 = vadd.f32 %v1812_v26, %v1760_v50  ;;  %v1351_v34 = vadd.f32 %v1320_v25, %v1319_v23  ;;  %v1322_v41 = vmul.f32 %v1252_v29, %v1252_v29 }
  0xfd   : > { %v748_v32 = vpop.f32.mrf.mxu1  ;;  %v1110_v33 = vpop.f32.mrf.mxu0 }
  0xfe   : > { %v1282_v35 = vadd.f32 %v1281_v28, %v1251_v30  ;;  %v1321_v36 = vmul.f32 %v1251_v30, %v1251_v30  ;;  %v749_v37 = vadd.f32 %v748_v32, %v424_v52  ;;  %v1254_v38 = vadd.f32 %v1864_v27, %v754_v31 }
  0xff   : > { %v1815_v39 = vpop.f32.mrf.mxu1  ;;  %v1867_v40 = vpop.f32.mrf.mxu0 }
 0x100   : > { %v1352_v42 = vadd.f32 %v1351_v34, %v1321_v36  ;;  %v1253_v44 = vadd.f32 %v1110_v33, %v749_v37  ;;  %v1283_v46 = vadd.f32 %v1282_v35, %v1252_v29  ;;  %v764_v48 = vadd.f32 %v1815_v39, %v1763_v54 }
 0x101   : > { %v758_v10 = vpop.f32.mrf.mxu1  ;;  %v1120_v11 = vpop.f32.mrf.mxu0  ;;  %v1324_v15 = vmul.f32 %v1254_v38, %v1254_v38 }
 0x102   : > { %v1284_v12 = vadd.f32 %v1283_v46, %v1253_v44  ;;  %v1323_v13 = vmul.f32 %v1253_v44, %v1253_v44  ;;  %v1353_v14 = vadd.f32 %v1352_v42, %v1322_v41  ;;  %v759_v50 = vadd.f32 %v758_v10, %v434_v56 }
 0x103   : > { %v1256_v16 = vadd.f32 %v1867_v40, %v764_v48  ;;  %v1818_v17 = vpop.f32.mrf.mxu1  ;;  %v1870_v18 = vpop.f32.mrf.mxu0 }
 0x104   : > { %v1354_v19 = vadd.f32 %v1353_v14, %v1323_v13  ;;  %v1255_v52 = vadd.f32 %v1120_v11, %v759_v50  ;;  %v1285_v20 = vadd.f32 %v1284_v12, %v1254_v38  ;;  %v774_v21 = vadd.f32 %v1818_v17, %v2273_v58 }
 0x105   : > { %v768_v22 = vpop.f32.mrf.mxu1  ;;  %v1130_v23 = vpop.f32.mrf.mxu0  ;;  %v1326_v29 = vmul.f32 %v1256_v16, %v1256_v16 }
 0x106   : > { %v1286_v24 = vadd.f32 %v1285_v20, %v1255_v52  ;;  %v1325_v25 = vmul.f32 %v1255_v52, %v1255_v52  ;;  %v1355_v54 = vadd.f32 %v1354_v19, %v1324_v15  ;;  %v769_v26 = vadd.f32 %v768_v22, %v2277_v60 }
 0x107   : > { %v1821_v27 = vpop.f32.mrf.mxu1  ;;  %v1873_v28 = vpop.f32.mrf.mxu0  ;;  %v1258_v30 = vadd.f32 %v1870_v18, %v774_v21 }
 0x108   : > { %v1356_v56 = vadd.f32 %v1355_v54, %v1325_v25  ;;  %v1287_v31 = vadd.f32 %v1286_v24, %v1256_v16  ;;  %v1257_v32 = vadd.f32 %v1130_v23, %v769_v26  ;;  %v784_v33 = vadd.f32 %v1821_v27, %v2281_v62 }
 0x109   : > { %v778_v34 = vpop.f32.mrf.mxu1  ;;  %v1140_v35 = vpop.f32.mrf.mxu0  ;;  %v1328_v41 = vmul.f32 %v1258_v30, %v1258_v30 }
 0x10a   : > { %v1357_v36 = vadd.f32 %v1356_v56, %v1326_v29  ;;  %v779_v58 = vadd.f32 %v778_v34, %v2285_v0  ;;  %v1288_v37 = vadd.f32 %v1287_v31, %v1257_v32  ;;  %v1327_v38 = vmul.f32 %v1257_v32, %v1257_v32 }
 0x10b   : > { %v1824_v39 = vpop.f32.mrf.mxu1  ;;  %v1876_v40 = vpop.f32.mrf.mxu0  ;;  %v1260_v44 = vadd.f32 %v1873_v28, %v784_v33 }
 0x10c   : > { %v1259_v60 = vadd.f32 %v1140_v35, %v779_v58  ;;  %v1358_v42 = vadd.f32 %v1357_v36, %v1327_v38  ;;  %v1289_v46 = vadd.f32 %v1288_v37, %v1258_v30  ;;  %v794_v48 = vadd.f32 %v1824_v39, %v2289_v2 }
 0x10d   : > { %v788_v10 = vpop.f32.mrf.mxu1  ;;  %v1150_v11 = vpop.f32.mrf.mxu0  ;;  %v1330_v17 = vmul.f32 %v1260_v44, %v1260_v44 }
 0x10e   : > { %v1329_v12 = vmul.f32 %v1259_v60, %v1259_v60  ;;  %v789_v62 = vadd.f32 %v788_v10, %v2293_v4  ;;  %v1290_v13 = vadd.f32 %v1289_v46, %v1259_v60  ;;  %v1359_v14 = vadd.f32 %v1358_v42, %v1328_v41 }
 0x10f   : > { %v1827_v50 = vpop.f32.mrf.mxu1  ;;  %v1879_v0 = vpop.f32.mrf.mxu0  ;;  %v1262_v19 = vadd.f32 %v1876_v40, %v794_v48 }
 0x110   : > { %v1261_v15 = vadd.f32 %v1150_v11, %v789_v62  ;;  %v804_v16 = vadd.f32 %v1827_v50, %v2297_v6  ;;  %v1360_v18 = vadd.f32 %v1359_v14, %v1329_v12  ;;  %v1291_v52 = vadd.f32 %v1290_v13, %v1260_v44 }
 0x111   : > { %v798_v20 = vpop.f32.mrf.mxu1  ;;  %v1160_v21 = vpop.f32.mrf.mxu0  ;;  %v1332_v27 = vmul.f32 %v1262_v19, %v1262_v19 }
 0x112   : > { %v1331_v22 = vmul.f32 %v1261_v15, %v1261_v15  ;;  %v799_v2 = vadd.f32 %v798_v20, %v2301_v8  ;;  %v1292_v23 = vadd.f32 %v1291_v52, %v1261_v15  ;;  %v1361_v24 = vadd.f32 %v1360_v18, %v1330_v17 }
 0x113   : > { %v1830_v25 = vpop.f32.mrf.mxu1  ;;  %v1882_v4 = vpop.f32.mrf.mxu0  ;;  %v1264_v54 = vadd.f32 %v1879_v0, %v804_v16 }
 0x114   : > { %v1263_v26 = vadd.f32 %v1160_v21, %v799_v2  ;;  %v1362_v28 = vadd.f32 %v1361_v24, %v1331_v22  ;;  %v1293_v29 = vadd.f32 %v1292_v23, %v1262_v19  ;;  %v814_v6 = vadd.f32 %v1830_v25, %v2257_v43 }
 0x115   : > { %v808_v56 = vpop.f32.mrf.mxu1  ;;  %v1170_v30 = vpop.f32.mrf.mxu0  ;;  %v1334_v36 = vmul.f32 %v1264_v54, %v1264_v54 }
 0x116   : > { %v1333_v31 = vmul.f32 %v1263_v26, %v1263_v26  ;;  %v809_v32 = vadd.f32 %v808_v56, %v2259_v45  ;;  %v1294_v33 = vadd.f32 %v1293_v29, %v1263_v26  ;;  %v1363_v34 = vadd.f32 %v1362_v28, %v1332_v27 }
 0x117   : > { %v1833_v35 = vpop.f32.mrf.mxu1  ;;  %v1885_v8 = vpop.f32.mrf.mxu0  ;;  %v1266_v38 = vadd.f32 %v1882_v4, %v814_v6 }
 0x118   : > { %v1265_v58 = vadd.f32 %v1170_v30, %v809_v32  ;;  %v1364_v37 = vadd.f32 %v1363_v34, %v1333_v31  ;;  %v1295_v39 = vadd.f32 %v1294_v33, %v1264_v54  ;;  %v824_v40 = vadd.f32 %v1833_v35, %v2261_v47 }
 0x119   : > { %v818_v41 = vpop.f32.mrf.mxu1  ;;  %v1180_v60 = vpop.f32.mrf.mxu0  ;;  %v1336_v12 = vmul.f32 %v1266_v38, %v1266_v38 }
 0x11a   : > { %v1335_v42 = vmul.f32 %v1265_v58, %v1265_v58  ;;  %v819_v43 = vadd.f32 %v818_v41, %v2263_v49  ;;  %v1296_v44 = vadd.f32 %v1295_v39, %v1265_v58  ;;  %v1365_v46 = vadd.f32 %v1364_v37, %v1334_v36 }
 0x11b   : > { %v1836_v48 = vpop.f32.mrf.mxu1  ;;  %v1888_v45 = vpop.f32.mrf.mxu0  ;;  %v1268_v13 = vadd.f32 %v1885_v8, %v824_v40 }
 0x11c   : > { %v1267_v10 = vadd.f32 %v1180_v60, %v819_v43  ;;  %v834_v11 = vadd.f32 %v1836_v48, %v2265_v51  ;;  %v1366_v62 = vadd.f32 %v1365_v46, %v1335_v42  ;;  %v1297_v14 = vadd.f32 %v1296_v44, %v1266_v38 }
 0x11d   : > { %v828_v50 = vpop.f32.mrf.mxu1  ;;  %v1190_v0 = vpop.f32.mrf.mxu0  ;;  %v1338_v20 = vmul.f32 %v1268_v13, %v1268_v13 }
 0x11e   : > { %v1337_v15 = vmul.f32 %v1267_v10, %v1267_v10  ;;  %v829_v47 = vadd.f32 %v828_v50, %v2267_v53  ;;  %v1298_v16 = vadd.f32 %v1297_v14, %v1267_v10  ;;  %v1367_v17 = vadd.f32 %v1366_v62, %v1336_v12 }
 0x11f   : > { %v1839_v18 = vpop.f32.mrf.mxu1  ;;  %v1891_v49 = vpop.f32.mrf.mxu0  ;;  %v1270_v19 = vadd.f32 %v1888_v45, %v834_v11 }
 0x120   : > { %v1269_v52 = vadd.f32 %v1190_v0, %v829_v47  ;;  %v1368_v21 = vadd.f32 %v1367_v17, %v1337_v15  ;;  %v1299_v22 = vadd.f32 %v1298_v16, %v1268_v13  ;;  %v844_v51 = vadd.f32 %v1839_v18, %v2269_v55 }
 0x121   : > { %v838_v2 = vpop.f32.mrf.mxu1  ;;  %v1200_v23 = vpop.f32.mrf.mxu0  ;;  %v1340_v27 = vmul.f32 %v1270_v19, %v1270_v19 }
 0x122   : > { %v1339_v24 = vmul.f32 %v1269_v52, %v1269_v52  ;;  %v839_v25 = vadd.f32 %v838_v2, %v2271_v57  ;;  %v1300_v4 = vadd.f32 %v1299_v22, %v1269_v52  ;;  %v1369_v54 = vadd.f32 %v1368_v21, %v1338_v20 }
 0x123   : > { %v1842_v26 = vpop.f32.mrf.mxu1  ;;  %v1894_v53 = vpop.f32.mrf.mxu0  ;;  %v1272_v6 = vadd.f32 %v1891_v49, %v844_v51 }
 0x124   : > { %v1271_v28 = vadd.f32 %v1200_v23, %v839_v25  ;;  %v1370_v29 = vadd.f32 %v1369_v54, %v1339_v24  ;;  %v1301_v56 = vadd.f32 %v1300_v4, %v1270_v19  ;;  %v854_v30 = vadd.f32 %v1842_v26, %v2275_v59 }
 0x125   : > { %v848_v31 = vpop.f32.mrf.mxu1  ;;  %v1210_v32 = vpop.f32.mrf.mxu0  ;;  %v1342_v37 = vmul.f32 %v1272_v6, %v1272_v6 }
 0x126   : > { %v1341_v33 = vmul.f32 %v1271_v28, %v1271_v28  ;;  %v849_v55 = vadd.f32 %v848_v31, %v2279_v61  ;;  %v1302_v34 = vadd.f32 %v1301_v56, %v1271_v28  ;;  %v1371_v35 = vadd.f32 %v1370_v29, %v1340_v27 }
 0x127   : > { %v1845_v8 = vpop.f32.mrf.mxu1  ;;  %v1897_v57 = vpop.f32.mrf.mxu0  ;;  %v1274_v39 = vadd.f32 %v1894_v53, %v854_v30 }
 0x128   : > { %v1273_v36 = vadd.f32 %v1210_v32, %v849_v55  ;;  %v864_v58 = vadd.f32 %v1845_v8, %v2283_v63  ;;  %v1372_v38 = vadd.f32 %v1371_v35, %v1341_v33  ;;  %v1303_v40 = vadd.f32 %v1302_v34, %v1272_v6 }
 0x129   : > { %v858_v41 = vpop.f32.mrf.mxu1  ;;  %v1220_v60 = vpop.f32.mrf.mxu0  ;;  %v1344_v10 = vmul.f32 %v1274_v39, %v1274_v39 }
 0x12a   : > { %v1343_v42 = vmul.f32 %v1273_v36, %v1273_v36  ;;  %v859_v59 = vadd.f32 %v858_v41, %v2287_v1  ;;  %v1304_v43 = vadd.f32 %v1303_v40, %v1273_v36  ;;  %v1373_v44 = vadd.f32 %v1372_v38, %v1342_v37 }
 0x12b   : > { %v1848_v46 = vpop.f32.mrf.mxu1  ;;  %v1900_v61 = vpop.f32.mrf.mxu0  ;;  %v1276_v48 = vadd.f32 %v1897_v57, %v864_v58 }
 0x12c   : > { %v1275_v45 = vadd.f32 %v1220_v60, %v859_v59  ;;  %v1374_v11 = vadd.f32 %v1373_v44, %v1343_v42  ;;  %v1305_v12 = vadd.f32 %v1304_v43, %v1274_v39  ;;  %v874_v63 = vadd.f32 %v1848_v46, %v2291_v3 }
 0x12d   : > { %v868_v62 = vpop.f32.mrf.mxu1  ;;  %v1230_v13 = vpop.f32.mrf.mxu0  ;;  %v1346_v16 = vmul.f32 %v1276_v48, %v1276_v48 }
 0x12e   : > { %v1345_v14 = vmul.f32 %v1275_v45, %v1275_v45  ;;  %v869_v50 = vadd.f32 %v868_v62, %v2295_v5  ;;  %v1306_v0 = vadd.f32 %v1305_v12, %v1275_v45  ;;  %v1375_v15 = vadd.f32 %v1374_v11, %v1344_v10 }
 0x12f   : > { %v1851_v47 = vpop.f32.mrf.mxu1  ;;  %v1903_v1 = vpop.f32.mrf.mxu0  ;;  %v1278_v49 = vadd.f32 %v1900_v61, %v874_v63 }
 0x130   : > { %v1277_v17 = vadd.f32 %v1230_v13, %v869_v50  ;;  %v1376_v18 = vadd.f32 %v1375_v15, %v1345_v14  ;;  %v1307_v19 = vadd.f32 %v1306_v0, %v1276_v48  ;;  %v884_v52 = vadd.f32 %v1851_v47, %v2299_v7 }
 0x131   : > { %v878_v20 = vpop.f32.mrf.mxu1  ;;  %v1240_v2 = vpop.f32.mrf.mxu0  ;;  %v1348_v5 = vmul.f32 %v1278_v49, %v1278_v49 }
 0x132   : > { %v1347_v21 = vmul.f32 %v1277_v17, %v1277_v17  ;;  %v879_v3 = vadd.f32 %v878_v20, %v2303_v9  ;;  %v1308_v22 = vadd.f32 %v1307_v19, %v1277_v17  ;;  %v1377_v51 = vadd.f32 %v1376_v18, %v1346_v16 }
 0x133   : > { %v1280_v25 = vadd.f32 %v1903_v1, %v884_v52 }
 0x134   : > { %v1279_v23 = vadd.f32 %v1240_v2, %v879_v3  ;;  %v1378_v24 = vadd.f32 %v1377_v51, %v1347_v21  ;;  %v1309_v4 = vadd.f32 %v1308_v22, %v1278_v49 }
 0x135   : > { %v1350_v27 = vmul.f32 %v1280_v25, %v1280_v25 }
 0x136   : > { %v1349_v54 = vmul.f32 %v1279_v23, %v1279_v23  ;;  %v1310_v26 = vadd.f32 %v1309_v4, %v1279_v23  ;;  %v1379_v53 = vadd.f32 %v1378_v24, %v1348_v5 }
 0x138   : > { %v1311_v28 = vadd.f32 %v1310_v26, %v1280_v25  ;;  %v1380_v29 = vadd.f32 %v1379_v53, %v1349_v54 }
 0x13a   : > { %v1312_v7 = vrot.slane %v1311_v28, 4  ;;  %v1381_v6 = vadd.f32 %v1380_v29, %v1350_v27 }
 0x13c   : > { %v1313_v56 = vadd.f32 %v1312_v7, %v1311_v28  ;;  %v1382_v30 = vrot.slane %v1381_v6, 4 }
 0x13e   : > { %v1314_v9 = vrot.slane %v1313_v56, 2  ;;  %v1383_v31 = vadd.f32 %v1382_v30, %v1381_v6 }
 0x140   : > { %v1315_v32 = vadd.f32 %v1314_v9, %v1313_v56  ;;  %v1384_v33 = vrot.slane %v1383_v31, 2 }
 0x142   : > { %v1316_v55 = vrot.slane %v1315_v32, 1  ;;  %v1385_v34 = vadd.f32 %v1384_v33, %v1383_v31 }
 0x144   : > { %v1317_v35 = vadd.f32 %v1316_v55, %v1315_v32  ;;  %v1386_v8 = vrot.slane %v1385_v34, 1 }
 0x146   : > { %1318 = vst [vmem:[%s161_s4] sm:$0x1] %v1317_v35  ;;  %v1387_v57 = vadd.f32 %v1386_v8, %v1385_v34 }
 0x148   : > { %1388 = vst [vmem:[%s161_s4 + $0x1] sm:$0x1] %v1387_v57 }
 0x149 PF: > { %s12_s11 = sadd.s32 1, %s1955_s11   ;;  %s2345_s9 = smov %s1951_s10 }
 0x14a   : > { %p9_p5 = scmp.ge.s32.totalorder %s12_s11, 4   ;;  %s2346_s10 = smov %s2348_s12 }
 0x14c   :  { %11 = sbr.rel (!%p9_p5) target bundleno = 2 (0x2), region = 63 }

// kernel: conv_block.3
= control target key start
LH: loop header
LB: loop body
LE: loop exit
PB: predicated region body
PF: predicated region fallthrough
CT: control target
= control target key end

     0   :  { %s2033_s15 = smov 0   ;;  %s2035_s16 = smov 0   ;;  %s2420_s0 = inlined_call_operand.vmem [shape: f32[2,18,16,12], index: 0, kind: input, shape index: {}]   ;;  %s2421_s1 = inlined_call_operand.vmem [shape: f32[3,12,128], index: 1, kind: input, shape index: {}]   ;;  %s2422_s2 = inlined_call_operand.vmem [shape: f32[8,1], index: 2, kind: input, shape index: {}]   ;;  %s2423_s3 = inlined_call_operand.vmem [shape: f32[8,1], index: 3, kind: input, shape index: {}]   ;;  %s2424_s4 = inlined_call_operand.vmem [shape: f32[2,8,256], index: 4, kind: output, shape index: {}]  }
   0x1   :  { %s2037_s17 = smov 0  }
   0x2 LB: > { %s26_s18 = sadd.s32 1, %s2001_s16  ;;  %p1519_p0 = scmp.ge.s32.totalorder %s2005_s17, 1  ;;  %s2005_s17 = sphi %s2037_s17, %s14_s17   ;;  %s2001_s16 = sphi %s2035_s16, %s2426_s16   ;;  %s1997_s15 = sphi %s2033_s15, %s2425_s15  }
   0x3   : > { %p28_p1 = scmp.ge.s32.totalorder %s26_s18, 2  ;;  %p176_p2 = scmp.lt.s32.totalorder %s2005_s17, 3 }
   0x5   : > { %s2428_s18 = smov (%p28_p1, %s26_s18), 0  ;;  %p177_p3 = pnand %p1519_p0, %p176_p2 }
   0x6   : > { %p206_p4 = scmp.lt.s32.totalorder (!%p177_p3), %s1997_s15, 1 }
   0x7   : > { %180 = sbr.rel (%p177_p3) target bundleno = 414 (0x19e), region = 36 }
   0xc   : > { %v1556_v0 = vld [vmem:[%s2421_s1 + $0x18] sm:$0xf]  ;;  %vm393_vm0 = vcmask 1043456   ;;  %v1555_v1 = vld [vmem:[%s2421_s1 + $0x10] sm:$0xff]  ;;  %s2430_s15 = smov (!%p206_p4, %s1997_s15), 1  ;;  %vm296_vm1 = vcmask 97280  }
   0xd   : > { %1951 = vmatprep.subr.msk.mxu1 %vm393_vm0, %v1556_v0  ;;  %1795 = vmatprep.subr.msk.mxu0 %vm393_vm0, %v1556_v0  ;;  %v257_v2 = vld [vmem:[%s2421_s1 + $0x8] sm:$0xf]  ;;  %s1955_s27 = smul.u32 288, %s2430_s15  ;;  %v256_v10 = vld [vmem:[%s2421_s1] sm:$0xff]  ;;  %v2007_v42 = vmov 0   ;;  %s1692_s13 = sshll.u32 %s2430_s15, 4 }
   0xe   : > { %1953 = vmatpush3.msk.msra.mxu1 %vm393_vm0, %v1556_v0  ;;  %1796 = vmatpush3.msk.msra.mxu0 %vm393_vm0, %v1556_v0  ;;  %v1656_v3 = vld [vmem:[%s2421_s1 + $0x28] sm:$0xf]  ;;  %v1655_v11 = vld [vmem:[%s2421_s1 + $0x20] sm:$0xff]  ;;  %s219_s20 = scalar_lea.vmem %s2424_s4, %s1692_s13 }
   0xf   : > { %1952 = vmatprep.subr.mxu1 %v1555_v1  ;;  %1797 = vmatprep.subr.mxu0 %v1555_v1  ;;  %s2075_s30 = scalar_lea.vmem %s2420_s0, %s1955_s27  ;;  %v1404_v40 = vld [vmem:[%s2422_s2] sm:$0xff] }
  0x10   : > { %1954 = vmatpush3.msra.mxu1 %v1555_v1  ;;  %1798 = vmatpush3.msra.mxu0 %v1555_v1  ;;  %v2078_v4 = vld [vmem:[%s2075_s30 + $0x10] sm:$0xff]  ;;  %v2084_v6 = vld [vmem:[%s2075_s30 + $0x18] sm:$0xff]  ;;  %v2094_v8 = vld [vmem:[%s2075_s30 + $0x20] sm:$0xff] }
  0x11   : > { %1847 = vmatprep.subr.msk.mxu1 %vm393_vm0, %v257_v2  ;;  %1899 = vmatprep.subr.msk.mxu0 %vm393_vm0, %v1656_v3  ;;  %v2081_v5 = vld [vmem:[%s2075_s30 + $0x90] sm:$0xff]  ;;  %v2091_v7 = vld [vmem:[%s2075_s30 + $0x98] sm:$0xff]  ;;  %v2097_v9 = vld [vmem:[%s2075_s30 + $0xa0] sm:$0xff] }
  0x12   : > { %1799 = vmatprep.mubr.msk.f32.mxu0 %vm296_vm1, %v2078_v4  ;;  %1823 = vmatprep.mubr.msk.f32.mxu1 %vm296_vm1, %v2081_v5  ;;  %v2112_v12 = vld [vmem:[%s2075_s30 + $0x28] sm:$0xff]  ;;  %v2122_v14 = vld [vmem:[%s2075_s30 + $0x30] sm:$0xff]  ;;  %v1528_v16 = vld [vmem:[%s2075_s30 + $0x38] sm:$0xff] }
  0x13   : > { %1800 = vmatmul.mubr.msk.f32.vlgmr.msra.gmra.mxu0 %vm296_vm1, %v2084_v6  ;;  %1824 = vmatmul.mubr.msk.f32.vlgmr.msra.gmra.mxu1 %vm296_vm1, %v2091_v7  ;;  %v2115_v13 = vld [vmem:[%s2075_s30 + $0xa8] sm:$0xff]  ;;  %v2125_v15 = vld [vmem:[%s2075_s30 + $0xb0] sm:$0xff]  ;;  %v2137_v17 = vld [vmem:[%s2075_s30 + $0xb8] sm:$0xff] }
  0x14   : > { %1848 = vmatpush3.msk.msra.mxu1 %vm393_vm0, %v257_v2  ;;  %1900 = vmatpush3.msk.msra.mxu0 %vm393_vm0, %v1656_v3  ;;  %v1529_v18 = vld [vmem:[%s2075_s30 + $0x40] sm:$0xff]  ;;  %v1530_v20 = vld [vmem:[%s2075_s30 + $0x48] sm:$0xff]  ;;  %v1531_v22 = vld [vmem:[%s2075_s30 + $0x50] sm:$0xff] }
  0x15   : > { %1802 = vmatprep.mubr.msk.f32.mxu0 %vm296_vm1, %v2094_v8  ;;  %1826 = vmatprep.mubr.msk.f32.mxu1 %vm296_vm1, %v2097_v9  ;;  %v2141_v19 = vld [vmem:[%s2075_s30 + $0xc0] sm:$0xff]  ;;  %v2151_v21 = vld [vmem:[%s2075_s30 + $0xc8] sm:$0xff]  ;;  %v2155_v23 = vld [vmem:[%s2075_s30 + $0xd0] sm:$0xff] }
  0x16   : > { %1849 = vmatprep.subr.mxu1 %v256_v10  ;;  %1901 = vmatprep.subr.mxu0 %v1655_v11  ;;  %v1532_v24 = vld [vmem:[%s2075_s30 + $0x58] sm:$0xff]  ;;  %v1533_v26 = vld [vmem:[%s2075_s30 + $0x60] sm:$0xff]  ;;  %v1534_v28 = vld [vmem:[%s2075_s30 + $0x68] sm:$0xff] }
  0x17   : > { %1803 = vmatmul.mubr.msk.f32.gmra.mxu0 %vm296_vm1, %v2112_v12  ;;  %1827 = vmatmul.mubr.msk.f32.gmra.mxu1 %vm296_vm1, %v2115_v13  ;;  %v2165_v25 = vld [vmem:[%s2075_s30 + $0xd8] sm:$0xff]  ;;  %v2169_v27 = vld [vmem:[%s2075_s30 + $0xe0] sm:$0xff]  ;;  %v2179_v29 = vld [vmem:[%s2075_s30 + $0xe8] sm:$0xff] }
  0x18   : > { %1805 = vmatprep.mubr.msk.f32.mxu0 %vm296_vm1, %v2122_v14  ;;  %1829 = vmatprep.mubr.msk.f32.mxu1 %vm296_vm1, %v2125_v15  ;;  %v1535_v30 = vld [vmem:[%s2075_s30 + $0x70] sm:$0xff]  ;;  %v1536_v32 = vld [vmem:[%s2075_s30 + $0x78] sm:$0xff]  ;;  %v1537_v34 = vld [vmem:[%s2075_s30 + $0x80] sm:$0xff] }
  0x19   : > { %1850 = vmatpush3.msra.mxu1 %v256_v10  ;;  %1902 = vmatpush3.msra.mxu0 %v1655_v11  ;;  %v2183_v31 = vld [vmem:[%s2075_s30 + $0xf0] sm:$0xff]  ;;  %v2193_v33 = vld [vmem:[%s2075_s30 + $0xf8] sm:$0xff]  ;;  %v2197_v35 = vld [vmem:[%s2075_s30 + $0x100] sm:$0xff] }
  0x1a   : > { %v1538_v36 = vld [vmem:[%s2075_s30 + $0x88] sm:$0xff]  ;;  %v224_v38 = vld [vmem:[%s2075_s30] sm:$0xff]  ;;  %v1653_v41 = vld [vmem:[%s2075_s30 + $0x110] sm:$0xff]  ;;  %1981 = vset.pattern.permute.xlu1 %v2007_v42 }
  0x1b   : > { %1806 = vmatmul.mubr.msk.f32.gmra.mxu0 %vm296_vm1, %v1528_v16  ;;  %1830 = vmatmul.mubr.msk.f32.gmra.mxu1 %vm296_vm1, %v2137_v17  ;;  %v2207_v37 = vld [vmem:[%s2075_s30 + $0x108] sm:$0xff]  ;;  %v1412_v43 = vld [vmem:[%s2423_s3] sm:$0xff]  ;;  %v1654_v44 = vld [vmem:[%s2075_s30 + $0x118] sm:$0xff] }
  0x1c   : > { %1808 = vmatprep.mubr.msk.f32.mxu0 %vm296_vm1, %v1529_v18  ;;  %1832 = vmatprep.mubr.msk.f32.mxu1 %vm296_vm1, %v2141_v19  ;;  %v225_v39 = vld [vmem:[%s2075_s30 + $0x8] sm:$0xff] }
  0x1d   : > { %1407 = vperm.xlu1 %1981, %v1404_v40  }
  0x1f   : > { %1809 = vmatmul.mubr.msk.f32.gmra.mxu0 %vm296_vm1, %v1530_v20  ;;  %1833 = vmatmul.mubr.msk.f32.gmra.mxu1 %vm296_vm1, %v2151_v21 }
  0x20   : > { %1811 = vmatprep.mubr.msk.f32.mxu0 %vm296_vm1, %v1531_v22  ;;  %1835 = vmatprep.mubr.msk.f32.mxu1 %vm296_vm1, %v2155_v23 }
  0x21   : > { %1415 = vperm.xlu1 %1981, %v1412_v43  }
  0x23   : > { %1812 = vmatmul.mubr.msk.f32.gmra.mxu0 %vm296_vm1, %v1532_v24  ;;  %1836 = vmatmul.mubr.msk.f32.gmra.mxu1 %vm296_vm1, %v2165_v25 }
  0x24   : > { %1814 = vmatprep.mubr.msk.f32.mxu0 %vm296_vm1, %v1533_v26  ;;  %1838 = vmatprep.mubr.msk.f32.mxu1 %vm296_vm1, %v2169_v27 }
  0x27   : > { %1815 = vmatmul.mubr.msk.f32.gmra.mxu0 %vm296_vm1, %v1534_v28  ;;  %1839 = vmatmul.mubr.msk.f32.gmra.mxu1 %vm296_vm1, %v2179_v29 }
  0x28   : > { %1817 = vmatprep.mubr.msk.f32.mxu0 %vm296_vm1, %v1535_v30  ;;  %1841 = vmatprep.mubr.msk.f32.mxu1 %vm296_vm1, %v2183_v31 }
  0x2b   : > { %1818 = vmatmul.mubr.msk.f32.gmra.mxu0 %vm296_vm1, %v1536_v32  ;;  %1842 = vmatmul.mubr.msk.f32.gmra.mxu1 %vm296_vm1, %v2193_v33 }
  0x2c   : > { %1820 = vmatprep.mubr.msk.f32.mxu0 %vm296_vm1, %v1537_v34  ;;  %1844 = vmatprep.mubr.msk.f32.mxu1 %vm296_vm1, %v2197_v35 }
  0x2f   : > { %1821 = vmatmul.mubr.msk.f32.gmra.mxu0 %vm296_vm1, %v1538_v36  ;;  %1845 = vmatmul.mubr.msk.f32.gmra.mxu1 %vm296_vm1, %v2207_v37 }
  0x30   : > { %1851 = vmatprep.mubr.msk.f32.mxu1 %vm296_vm1, %v224_v38  ;;  %1903 = vmatprep.mubr.msk.f32.mxu0 %vm296_vm1, %v2094_v8 }
  0x33   : > { %1852 = vmatmul.mubr.msk.f32.vlgmr.msra.gmra.mxu1 %vm296_vm1, %v225_v39  ;;  %1904 = vmatmul.mubr.msk.f32.vlgmr.msra.gmra.mxu0 %vm296_vm1, %v2112_v12 }
  0x34   : > { %1854 = vmatprep.mubr.msk.f32.mxu1 %vm296_vm1, %v2078_v4  ;;  %1906 = vmatprep.mubr.msk.f32.mxu0 %vm296_vm1, %v2122_v14 }
  0x37   : > { %1855 = vmatmul.mubr.msk.f32.gmra.mxu1 %vm296_vm1, %v2084_v6  ;;  %1907 = vmatmul.mubr.msk.f32.gmra.mxu0 %vm296_vm1, %v1528_v16 }
  0x38   : > { %1857 = vmatprep.mubr.msk.f32.mxu1 %vm296_vm1, %v2094_v8  ;;  %1909 = vmatprep.mubr.msk.f32.mxu0 %vm296_vm1, %v1529_v18 }
  0x3b   : > { %1858 = vmatmul.mubr.msk.f32.gmra.mxu1 %vm296_vm1, %v2112_v12  ;;  %1910 = vmatmul.mubr.msk.f32.gmra.mxu0 %vm296_vm1, %v1530_v20 }
  0x3c   : > { %1860 = vmatprep.mubr.msk.f32.mxu1 %vm296_vm1, %v2122_v14  ;;  %1912 = vmatprep.mubr.msk.f32.mxu0 %vm296_vm1, %v1531_v22 }
  0x3f   : > { %1861 = vmatmul.mubr.msk.f32.gmra.mxu1 %vm296_vm1, %v1528_v16  ;;  %1913 = vmatmul.mubr.msk.f32.gmra.mxu0 %vm296_vm1, %v1532_v24 }
  0x40   : > { %1863 = vmatprep.mubr.msk.f32.mxu1 %vm296_vm1, %v1529_v18  ;;  %1915 = vmatprep.mubr.msk.f32.mxu0 %vm296_vm1, %v1533_v26 }
  0x43   : > { %1864 = vmatmul.mubr.msk.f32.gmra.mxu1 %vm296_vm1, %v1530_v20  ;;  %1916 = vmatmul.mubr.msk.f32.gmra.mxu0 %vm296_vm1, %v1534_v28 }
  0x44   : > { %1866 = vmatprep.mubr.msk.f32.mxu1 %vm296_vm1, %v1531_v22  ;;  %1918 = vmatprep.mubr.msk.f32.mxu0 %vm296_vm1, %v1535_v30 }
  0x47   : > { %1867 = vmatmul.mubr.msk.f32.gmra.mxu1 %vm296_vm1, %v1532_v24  ;;  %1919 = vmatmul.mubr.msk.f32.gmra.mxu0 %vm296_vm1, %v1536_v32 }
  0x48   : > { %1869 = vmatprep.mubr.msk.f32.mxu1 %vm296_vm1, %v1533_v26  ;;  %1921 = vmatprep.mubr.msk.f32.mxu0 %vm296_vm1, %v1537_v34 }
  0x4b   : > { %1870 = vmatmul.mubr.msk.f32.gmra.mxu1 %vm296_vm1, %v1534_v28  ;;  %1922 = vmatmul.mubr.msk.f32.gmra.mxu0 %vm296_vm1, %v1538_v36 }
  0x4c   : > { %1872 = vmatprep.mubr.msk.f32.mxu1 %vm296_vm1, %v1535_v30  ;;  %1924 = vmatprep.mubr.msk.f32.mxu0 %vm296_vm1, %v2081_v5 }
  0x4f   : > { %1873 = vmatmul.mubr.msk.f32.gmra.mxu1 %vm296_vm1, %v1536_v32  ;;  %1925 = vmatmul.mubr.msk.f32.gmra.mxu0 %vm296_vm1, %v2091_v7 }
  0x50   : > { %1875 = vmatprep.mubr.msk.f32.mxu1 %vm296_vm1, %v1537_v34  ;;  %1927 = vmatprep.mubr.msk.f32.mxu0 %vm296_vm1, %v2097_v9 }
  0x53   : > { %1876 = vmatmul.mubr.msk.f32.gmra.mxu1 %vm296_vm1, %v1538_v36  ;;  %1928 = vmatmul.mubr.msk.f32.gmra.mxu0 %vm296_vm1, %v2115_v13 }
  0x54   : > { %1878 = vmatprep.mubr.msk.f32.mxu1 %vm296_vm1, %v2081_v5  ;;  %1930 = vmatprep.mubr.msk.f32.mxu0 %vm296_vm1, %v2125_v15 }
  0x57   : > { %1879 = vmatmul.mubr.msk.f32.gmra.mxu1 %vm296_vm1, %v2091_v7  ;;  %1931 = vmatmul.mubr.msk.f32.gmra.mxu0 %vm296_vm1, %v2137_v17 }
  0x58   : > { %1881 = vmatprep.mubr.msk.f32.mxu1 %vm296_vm1, %v2097_v9  ;;  %1933 = vmatprep.mubr.msk.f32.mxu0 %vm296_vm1, %v2141_v19 }
  0x5b   : > { %1882 = vmatmul.mubr.msk.f32.gmra.mxu1 %vm296_vm1, %v2115_v13  ;;  %1934 = vmatmul.mubr.msk.f32.gmra.mxu0 %vm296_vm1, %v2151_v21 }
  0x5c   : > { %1884 = vmatprep.mubr.msk.f32.mxu1 %vm296_vm1, %v2125_v15  ;;  %1936 = vmatprep.mubr.msk.f32.mxu0 %vm296_vm1, %v2155_v23 }
  0x5f   : > { %1885 = vmatmul.mubr.msk.f32.gmra.mxu1 %vm296_vm1, %v2137_v17  ;;  %1937 = vmatmul.mubr.msk.f32.gmra.mxu0 %vm296_vm1, %v2165_v25 }
  0x60   : > { %1887 = vmatprep.mubr.msk.f32.mxu1 %vm296_vm1, %v2141_v19  ;;  %1939 = vmatprep.mubr.msk.f32.mxu0 %vm296_vm1, %v2169_v27 }
  0x63   : > { %1888 = vmatmul.mubr.msk.f32.gmra.mxu1 %vm296_vm1, %v2151_v21  ;;  %1940 = vmatmul.mubr.msk.f32.gmra.mxu0 %vm296_vm1, %v2179_v29 }
  0x64   : > { %1890 = vmatprep.mubr.msk.f32.mxu1 %vm296_vm1, %v2155_v23  ;;  %1942 = vmatprep.mubr.msk.f32.mxu0 %vm296_vm1, %v2183_v31 }
  0x67   : > { %1891 = vmatmul.mubr.msk.f32.gmra.mxu1 %vm296_vm1, %v2165_v25  ;;  %1943 = vmatmul.mubr.msk.f32.gmra.mxu0 %vm296_vm1, %v2193_v33 }
  0x68   : > { %1893 = vmatprep.mubr.msk.f32.mxu1 %vm296_vm1, %v2169_v27  ;;  %1945 = vmatprep.mubr.msk.f32.mxu0 %vm296_vm1, %v2197_v35 }
  0x6b   : > { %1894 = vmatmul.mubr.msk.f32.gmra.mxu1 %vm296_vm1, %v2179_v29  ;;  %1946 = vmatmul.mubr.msk.f32.gmra.mxu0 %vm296_vm1, %v2207_v37 }
  0x6c   : > { %1896 = vmatprep.mubr.msk.f32.mxu1 %vm296_vm1, %v2183_v31  ;;  %1948 = vmatprep.mubr.msk.f32.mxu0 %vm296_vm1, %v1653_v41 }
  0x6f   : > { %1897 = vmatmul.mubr.msk.f32.gmra.mxu1 %vm296_vm1, %v2193_v33  ;;  %1949 = vmatmul.mubr.msk.f32.gmra.mxu0 %vm296_vm1, %v1654_v44 }
  0xd3   : > { %v1801_v45 = vpop.f32.mrf.mxu0  ;;  %v2325_v46 = vpop.f32.mrf.mxu1 }
  0xd5   : > { %v463_v47 = vpop.f32.mrf.mxu0  ;;  %v2327_v48 = vpop.f32.mrf.mxu1 }
  0xd7   : > { %v1804_v49 = vpop.f32.mrf.mxu0  ;;  %v2329_v50 = vpop.f32.mrf.mxu1 }
  0xd9   : > { %v473_v51 = vpop.f32.mrf.mxu0  ;;  %v2331_v52 = vpop.f32.mrf.mxu1 }
  0xdb   : > { %v1807_v53 = vpop.f32.mrf.mxu0  ;;  %v2333_v54 = vpop.f32.mrf.mxu1 }
  0xdd   : > { %v483_v55 = vpop.f32.mrf.mxu0  ;;  %v2335_v56 = vpop.f32.mrf.mxu1 }
  0xdf   : > { %v2337_v57 = vpop.f32.mrf.mxu0  ;;  %v2339_v58 = vpop.f32.mrf.mxu1 }
  0xe1   : > { %v493_v59 = vpop.f32.mrf.mxu0  ;;  %v2341_v60 = vpop.f32.mrf.mxu1 }
  0xe3   : > { %v2343_v61 = vpop.f32.mrf.mxu0  ;;  %v2345_v62 = vpop.f32.mrf.mxu1 }
  0xe5   : > { %v2347_v63 = vpop.f32.mrf.mxu0  ;;  %v2349_v0 = vpop.f32.mrf.mxu1 }
  0xe7   : > { %v2351_v1 = vpop.f32.mrf.mxu0  ;;  %v2353_v2 = vpop.f32.mrf.mxu1 }
  0xe9   : > { %v2355_v3 = vpop.f32.mrf.mxu0  ;;  %v2357_v4 = vpop.f32.mrf.mxu1 }
  0xeb   : > { %v2359_v5 = vpop.f32.mrf.mxu0  ;;  %v2361_v6 = vpop.f32.mrf.mxu1 }
  0xed   : > { %v2363_v7 = vpop.f32.mrf.mxu0  ;;  %v2365_v8 = vpop.f32.mrf.mxu1 }
  0xef   : > { %v2367_v9 = vpop.f32.mrf.mxu0  ;;  %v2369_v10 = vpop.f32.mrf.mxu1 }
  0xf1   : > { %v2371_v11 = vpop.f32.mrf.mxu0  ;;  %v2373_v12 = vpop.f32.mrf.mxu1 }
  0xf3   : > { %v1853_v13 = vpop.f32.mrf.mxu1  ;;  %v1905_v14 = vpop.f32.mrf.mxu0 }
  0xf4   : > { %v793_v20 = vadd.f32 %v1853_v13, %v1801_v45 }
  0xf5   : > { %v787_v15 = vpop.f32.mrf.mxu1  ;;  %v1149_v16 = vpop.f32.mrf.mxu0 }
  0xf6   : > { %v788_v17 = vadd.f32 %v787_v15, %v463_v47  ;;  %v1309_v26 = vadd.f32 %v1905_v14, %v793_v20 }
  0xf7   : > { %v1856_v18 = vpop.f32.mrf.mxu1  ;;  %v1908_v19 = vpop.f32.mrf.mxu0 }
  0xf8   : > { %v1308_v21 = vadd.f32 %v1149_v16, %v788_v17  ;;  %v803_v32 = vadd.f32 %v1856_v18, %v1804_v49 }
  0xf9   : > { %v797_v22 = vpop.f32.mrf.mxu1  ;;  %v1159_v23 = vpop.f32.mrf.mxu0 }
  0xfa   : > { %1340 = vxpose.xlu0.b32.start [1/16] (narrow) %v1308_v21, 8  ;;  %v798_v27 = vadd.f32 %v797_v22, %v473_v51  ;;  %v1311_v38 = vadd.f32 %v1908_v19, %v803_v32 }
  0xfb   : > { %v1859_v24 = vpop.f32.mrf.mxu1  ;;  %v1911_v25 = vpop.f32.mrf.mxu0 }
  0xfc   : > { %v1310_v33 = vadd.f32 %v1159_v23, %v798_v27  ;;  %v813_v45 = vadd.f32 %v1859_v24, %v1807_v53 }
  0xfd   : > { %v807_v28 = vpop.f32.mrf.mxu1  ;;  %v1169_v29 = vpop.f32.mrf.mxu0 }
  0xfe   : > { %1341 = vxpose.xlu0.b32.cont [2/16] (narrow) %v1309_v26, 8  ;;  %v808_v39 = vadd.f32 %v807_v28, %v483_v55  ;;  %v1313_v15 = vadd.f32 %v1911_v25, %v813_v45 }
  0xff   : > { %v1862_v30 = vpop.f32.mrf.mxu1  ;;  %v1914_v31 = vpop.f32.mrf.mxu0 }
 0x100   : > { %v1312_v47 = vadd.f32 %v1169_v29, %v808_v39  ;;  %v823_v19 = vadd.f32 %v1862_v30, %v2337_v57 }
 0x101   : > { %v817_v34 = vpop.f32.mrf.mxu1  ;;  %v1179_v35 = vpop.f32.mrf.mxu0 }
 0x102   : > { %1342 = vxpose.xlu0.b32.cont [3/16] (narrow) %v1310_v33, 8  ;;  %v818_v16 = vadd.f32 %v817_v34, %v493_v59  ;;  %v1315_v26 = vadd.f32 %v1914_v31, %v823_v19 }
 0x103   : > { %v1865_v36 = vpop.f32.mrf.mxu1  ;;  %v1917_v37 = vpop.f32.mrf.mxu0 }
 0x104   : > { %v1314_v21 = vadd.f32 %v1179_v35, %v818_v16  ;;  %v833_v32 = vadd.f32 %v1865_v36, %v2343_v61 }
 0x105   : > { %v827_v40 = vpop.f32.mrf.mxu1  ;;  %v1189_v41 = vpop.f32.mrf.mxu0 }
 0x106   : > { %1343 = vxpose.xlu0.b32.cont [4/16] (narrow) %v1311_v38, 8  ;;  %v828_v27 = vadd.f32 %v827_v40, %v2347_v63  ;;  %v1317_v38 = vadd.f32 %v1917_v37, %v833_v32 }
 0x107   : > { %v1868_v43 = vpop.f32.mrf.mxu1  ;;  %v1920_v44 = vpop.f32.mrf.mxu0 }
 0x108   : > { %v1316_v33 = vadd.f32 %v1189_v41, %v828_v27  ;;  %v843_v61 = vadd.f32 %v1868_v43, %v2351_v1 }
 0x109   : > { %v837_v51 = vpop.f32.mrf.mxu1  ;;  %v1199_v13 = vpop.f32.mrf.mxu0 }
 0x10a   : > { %1344 = vxpose.xlu0.b32.cont [5/16] (narrow) %v1312_v47, 8  ;;  %v838_v31 = vadd.f32 %v837_v51, %v2355_v3  ;;  %v1319_v37 = vadd.f32 %v1920_v44, %v843_v61 }
 0x10b   : > { %v1871_v14 = vpop.f32.mrf.mxu1  ;;  %v1923_v49 = vpop.f32.mrf.mxu0 }
 0x10c   : > { %v1318_v36 = vadd.f32 %v1199_v13, %v838_v31  ;;  %v853_v1 = vadd.f32 %v1871_v14, %v2359_v5 }
 0x10d   : > { %v847_v17 = vpop.f32.mrf.mxu1  ;;  %v1209_v18 = vpop.f32.mrf.mxu0 }
 0x10e   : > { %1345 = vxpose.xlu0.b32.cont [6/16] (narrow) %v1313_v15, 8  ;;  %v848_v3 = vadd.f32 %v847_v17, %v2363_v7  ;;  %v1321_v44 = vadd.f32 %v1923_v49, %v853_v1 }
 0x10f   : > { %v2375_v20 = vpop.f32.mrf.mxu1  ;;  %v2377_v55 = vpop.f32.mrf.mxu0 }
 0x110   : > { %v1320_v43 = vadd.f32 %v1209_v18, %v848_v3  ;;  %v863_v5 = vadd.f32 %v2375_v20, %v2367_v9 }
 0x111   : > { %v857_v22 = vpop.f32.mrf.mxu1  ;;  %v1219_v53 = vpop.f32.mrf.mxu0 }
 0x112   : > { %1346 = vxpose.xlu0.b32.cont [7/16] (narrow) %v1314_v21, 8  ;;  %v858_v7 = vadd.f32 %v857_v22, %v2371_v11  ;;  %v1323_v11 = vadd.f32 %v2377_v55, %v863_v5 }
 0x113   : > { %v1877_v23 = vpop.f32.mrf.mxu1  ;;  %v1929_v24 = vpop.f32.mrf.mxu0 }
 0x114   : > { %v873_v57 = vadd.f32 %v1877_v23, %v2325_v46  ;;  %v1322_v14 = vadd.f32 %v1219_v53, %v858_v7 }
 0x115   : > { %v867_v25 = vpop.f32.mrf.mxu1  ;;  %v1229_v28 = vpop.f32.mrf.mxu0 }
 0x116   : > { %v868_v59 = vadd.f32 %v867_v25, %v2327_v48  ;;  %1347 = vxpose.xlu0.b32.cont [8/16] (narrow) %v1315_v26, 8  ;;  %v1325_v63 = vadd.f32 %v1929_v24, %v873_v57 }
 0x117   : > { %v1880_v29 = vpop.f32.mrf.mxu1  ;;  %v1932_v35 = vpop.f32.mrf.mxu0 }
 0x118   : > { %v1324_v30 = vadd.f32 %v1229_v28, %v868_v59  ;;  %v883_v46 = vadd.f32 %v1880_v29, %v2329_v50 }
 0x119   : > { %v877_v34 = vpop.f32.mrf.mxu1  ;;  %v1239_v40 = vpop.f32.mrf.mxu0 }
 0x11a   : > { %1372 = vxpose.xlu1.b32.start [1/16] (narrow) %v1324_v30, 8  ;;  %1348 = vxpose.xlu0.b32.cont [9/16] (narrow) %v1316_v33, 8  ;;  %v878_v39 = vadd.f32 %v877_v34, %v2331_v52  ;;  %v1327_v51 = vadd.f32 %v1932_v35, %v883_v46 }
 0x11b   : > { %v1883_v48 = vpop.f32.mrf.mxu1  ;;  %v1935_v47 = vpop.f32.mrf.mxu0 }
 0x11c   : > { %v1326_v41 = vadd.f32 %v1239_v40, %v878_v39  ;;  %v893_v50 = vadd.f32 %v1883_v48, %v2333_v54 }
 0x11d   : > { %v887_v45 = vpop.f32.mrf.mxu1  ;;  %v1249_v16 = vpop.f32.mrf.mxu0 }
 0x11e   : > { %1373 = vxpose.xlu1.b32.cont [2/16] (narrow) %v1325_v63, 8  ;;  %1349 = vxpose.xlu0.b32.cont [10/16] (narrow) %v1317_v38, 8  ;;  %v888_v52 = vadd.f32 %v887_v45, %v2335_v56  ;;  %v1329_v17 = vadd.f32 %v1935_v47, %v893_v50 }
 0x11f   : > { %v1886_v15 = vpop.f32.mrf.mxu1  ;;  %v1938_v21 = vpop.f32.mrf.mxu0 }
 0x120   : > { %v1328_v13 = vadd.f32 %v1249_v16, %v888_v52  ;;  %v903_v54 = vadd.f32 %v1886_v15, %v2339_v58 }
 0x121   : > { %v897_v19 = vpop.f32.mrf.mxu1  ;;  %v1259_v24 = vpop.f32.mrf.mxu0 }
 0x122   : > { %1374 = vxpose.xlu1.b32.cont [3/16] (narrow) %v1326_v41, 8  ;;  %1350 = vxpose.xlu0.b32.cont [11/16] (narrow) %v1318_v36, 8  ;;  %v898_v56 = vadd.f32 %v897_v19, %v2341_v60  ;;  %v1331_v49 = vadd.f32 %v1938_v21, %v903_v54  ;;  %v1408_v36 = vpop.permute.xlu1 %1407 }
 0x123   : > { %v1889_v23 = vpop.f32.mrf.mxu1  ;;  %v1941_v27 = vpop.f32.mrf.mxu0 }
 0x124   : > { %v1330_v18 = vadd.f32 %v1259_v24, %v898_v56  ;;  %v913_v59 = vadd.f32 %v1889_v23, %v2345_v62 }
 0x125   : > { %v907_v26 = vpop.f32.mrf.mxu1  ;;  %v1269_v25 = vpop.f32.mrf.mxu0 }
 0x126   : > { %1375 = vxpose.xlu1.b32.cont [4/16] (narrow) %v1327_v51, 8  ;;  %1351 = vxpose.xlu0.b32.cont [12/16] (narrow) %v1319_v37, 8  ;;  %v908_v60 = vadd.f32 %v907_v26, %v2349_v0  ;;  %v1333_v58 = vadd.f32 %v1941_v27, %v913_v59  ;;  %v1416_v41 = vpop.permute.xlu1 %1415 }
 0x127   : > { %v1892_v22 = vpop.f32.mrf.mxu1  ;;  %v1944_v53 = vpop.f32.mrf.mxu0 }
 0x128   : > { %v1332_v9 = vadd.f32 %v1269_v25, %v908_v60  ;;  %v923_v55 = vadd.f32 %v1892_v22, %v2353_v2 }
 0x129   : > { %v917_v20 = vpop.f32.mrf.mxu1  ;;  %v1279_v32 = vpop.f32.mrf.mxu0 }
 0x12a   : > { %1376 = vxpose.xlu1.b32.cont [5/16] (narrow) %v1328_v13, 8  ;;  %1352 = vxpose.xlu0.b32.cont [13/16] (narrow) %v1320_v43, 8  ;;  %v918_v28 = vadd.f32 %v917_v20, %v2357_v4  ;;  %v1335_v30 = vadd.f32 %v1944_v53, %v923_v55 }
 0x12b   : > { %v1895_v29 = vpop.f32.mrf.mxu1  ;;  %v1947_v57 = vpop.f32.mrf.mxu0 }
 0x12c   : > { %v1334_v33 = vadd.f32 %v1279_v32, %v918_v28  ;;  %v933_v38 = vadd.f32 %v1895_v29, %v2361_v6 }
 0x12d   : > { %v927_v0 = vpop.f32.mrf.mxu1  ;;  %v1289_v35 = vpop.f32.mrf.mxu0 }
 0x12e   : > { %1377 = vxpose.xlu1.b32.cont [6/16] (narrow) %v1329_v17, 8  ;;  %1353 = vxpose.xlu0.b32.cont [14/16] (narrow) %v1321_v44, 8  ;;  %v928_v34 = vadd.f32 %v927_v0, %v2365_v8  ;;  %v1337_v39 = vadd.f32 %v1947_v57, %v933_v38 }
 0x12f   : > { %v1898_v62 = vpop.f32.mrf.mxu1  ;;  %v1950_v63 = vpop.f32.mrf.mxu0 }
 0x130   : > { %v1336_v31 = vadd.f32 %v1289_v35, %v928_v34  ;;  %v943_v40 = vadd.f32 %v1898_v62, %v2369_v10 }
 0x131   : > { %v937_v4 = vpop.f32.mrf.mxu1  ;;  %v1299_v48 = vpop.f32.mrf.mxu0 }
 0x132   : > { %1378 = vxpose.xlu1.b32.cont [7/16] (narrow) %v1330_v18, 8  ;;  %1354 = vxpose.xlu0.b32.cont [15/16] (narrow) %v1322_v14, 8  ;;  %v938_v2 = vadd.f32 %v937_v4, %v2373_v12  ;;  %v1339_v8 = vadd.f32 %v1950_v63, %v943_v40 }
 0x134   : > { %v1338_v61 = vadd.f32 %v1299_v48, %v938_v2 }
 0x136   : > { %1379 = vxpose.xlu1.b32.cont [8/16] (narrow) %v1331_v49, 8  ;;  %1355 = vxpose.xlu0.b32.end [16/16] (narrow) %v1323_v11, 8 }
 0x13a   : > { %1380 = vxpose.xlu1.b32.cont [9/16] (narrow) %v1332_v9, 8 }
 0x13e   : > { %1381 = vxpose.xlu1.b32.cont [10/16] (narrow) %v1333_v58, 8 }
 0x142   : > { %1382 = vxpose.xlu1.b32.cont [11/16] (narrow) %v1334_v33, 8 }
 0x146   : > { %1383 = vxpose.xlu1.b32.cont [12/16] (narrow) %v1335_v30, 8 }
 0x14a   : > { %1384 = vxpose.xlu1.b32.cont [13/16] (narrow) %v1336_v31, 8 }
 0x14e   : > { %1385 = vxpose.xlu1.b32.cont [14/16] (narrow) %v1337_v39, 8 }
 0x152   : > { %1386 = vxpose.xlu1.b32.cont [15/16] (narrow) %v1338_v61, 8 }
 0x156   : > { %1387 = vxpose.xlu1.b32.end [16/16] (narrow) %v1339_v8, 8 }
 0x15f   : > { %1982 = vset.pattern.permute.xlu0 %v2007_v42 }
 0x176   : > { %v1356_v6 = vpop.trf.xlu0 }
 0x177   : > { %v1410_v46 = vmul.f32 %v1408_v36, %v1356_v6 }
 0x179   : > { %v1418_v45 = vadd.f32 %v1416_v41, %v1410_v46 }
 0x17b   : > { %v1420_v12 = vmax.f32 %v1418_v45, 0.0 }
 0x17d   : > { %1422 = vst [vmem:[%s219_s20] sm:$0xff] %v1420_v12 }
 0x196   : > { %v1388_v47 = vpop.trf.xlu1 }
 0x197   : > { %v1411_v10 = vmul.f32 %v1408_v36, %v1388_v47 }
 0x199   : > { %v1419_v37 = vadd.f32 %v1416_v41, %v1411_v10 }
 0x19b   : > { %v1421_v3 = vmax.f32 %v1419_v37, 0.0 }
 0x19d   : > { %1423 = vst [vmem:[%s219_s20 + $0x8] sm:$0xff] %v1421_v3 }
 0x19e PF: > { %s14_s17 = sadd.s32 1, %s2005_s17   ;;  %s2425_s15 = smov %s2001_s16 }
 0x19f   : > { %p11_p5 = scmp.ge.s32.totalorder %s14_s17, 4   ;;  %s2426_s16 = smov %s2428_s18 }
 0x1a1   :  { %13 = sbr.rel (!%p11_p5) target bundleno = 2 (0x2), region = 71 }

</bundles_post_ra>
